<compile_context>
chip_gen: v5e
topology: v5e:2x2
jax: 0.10.0
libtpu: 0.0.40
codegen_flags: <defaults>
</compile_context>

<pallas_src>
import functools

import jax
import jax.numpy as jnp
from jax import lax
from jax.experimental import pallas as pl
from jax.experimental.pallas import tpu as pltpu


# --------------------------------------------------------------------------- kernel 1
def rnn_recurrence_kernel(
    emb_ref,     # (T, B, E)   this chunk's embedded inputs
    h0_ref,      # (B, H)      initial hidden state
    wcat_ref,    # (E+H, H)    [W_ih^T ; W_hh^T]
    bcat_ref,    # (1, H)      b_ih + b_hh
    hall_ref,    # (T, B, H)   out: hidden state for every step of the chunk
    hfinal_ref,  # (B, H)      out: final hidden state (written on last chunk)
    h_carry,     # (B, H) f32  VMEM scratch: hidden carried across chunks
):
    c = pl.program_id(0)
    T = emb_ref.shape[0]

    @pl.when(c == 0)
    def _init():
        h_carry[...] = h0_ref[...].astype(jnp.float32)

    def step(i, h):
        x = emb_ref[i].astype(jnp.float32)               # (B, E)
        xh = jnp.concatenate([x, h], axis=-1)            # (B, E+H)
        pre = jnp.dot(xh, wcat_ref[...],
                      preferred_element_type=jnp.float32) + bcat_ref[...]
        h_new = jnp.tanh(pre)                            # (B, H)
        hall_ref[i] = h_new.astype(hall_ref.dtype)
        return h_new

    # hidden state lives in vregs across the (unrolled) inner time loop
    h_last = lax.fori_loop(0, T, step, h_carry[...], unroll=True)
    h_carry[...] = h_last

    @pl.when(c == pl.num_programs(0) - 1)
    def _finalize():
        hfinal_ref[...] = h_last.astype(hfinal_ref.dtype)


# --------------------------------------------------------------------------- kernel 2
def pool_logsoftmax_kernel(
    h_ref,       # (RB, H)  hidden rows (flattened over seq*batch)
    wpool_ref,   # (H, V)   pooling weight^T
    bpool_ref,   # (1, V)
    logp_ref,    # (RB, V)  out: log_softmax(pooled)
):
    h = h_ref[...].astype(jnp.float32)
    logits = jnp.dot(h, wpool_ref[...],
                     preferred_element_type=jnp.float32) + bpool_ref[...]
    m = jnp.max(logits, axis=-1, keepdims=True)
    z = logits - m
    lse = jnp.log(jnp.sum(jnp.exp(z), axis=-1, keepdims=True))
    logp_ref[...] = (z - lse).astype(logp_ref.dtype)


# --------------------------------------------------------------------------- helpers
def _choose_seq_chunk(s, max_chunk=32):
    if s <= max_chunk:
        return s
    for c in range(max_chunk, 0, -1):
        if s % c == 0:
            return c
    return 1


def _choose_row_block(n, max_rows=256):
    if n <= max_rows:
        return n
    for c in range(max_rows - (max_rows % 8), 7, -8):
        if n % c == 0:
            return c
    return n


# --------------------------------------------------------------------------- wrapper
@functools.partial(jax.jit, static_argnames=())
def rnn_lm_forward(emb, h0, w_ih, w_hh, b_ih, b_hh, w_pool, b_pool):
    """emb: (S, B, E) f32 ; h0: (1, B, H) f32.
    Returns (log_probs (S*B, V), hidden (1, B, H))."""
    S, B, E = emb.shape
    H = w_hh.shape[0]
    V = w_pool.shape[0]

    # fuse the two recurrent matmuls: [x, h] @ [W_ih^T ; W_hh^T] + (b_ih + b_hh)
    w_cat = jnp.concatenate([w_ih.T, w_hh.T], axis=0)      # (E+H, H)
    b_cat = (b_ih + b_hh).reshape(1, H)
    w_pool_t = w_pool.T                                     # (H, V)
    b_pool2 = b_pool.reshape(1, V)

    T = _choose_seq_chunk(S)
    n_chunks = S // T

    # ---- sequential recurrence: only the Elman cell on the serial path ------
    h_all, h_final = pl.pallas_call(
        rnn_recurrence_kernel,
        out_shape=(
            jax.ShapeDtypeStruct((S, B, H), jnp.float32),
            jax.ShapeDtypeStruct((B, H), jnp.float32),
        ),
        grid_spec=pltpu.PrefetchScalarGridSpec(
            num_scalar_prefetch=0,
            grid=(n_chunks,),
            in_specs=[
                pl.BlockSpec((T, B, E), lambda c: (c, 0, 0)),    # emb chunk
                pl.BlockSpec((B, H), lambda c: (0, 0)),          # h0
                pl.BlockSpec((E + H, H), lambda c: (0, 0)),      # fused weight
                pl.BlockSpec((1, H), lambda c: (0, 0)),          # fused bias
            ],
            out_specs=[
                pl.BlockSpec((T, B, H), lambda c: (c, 0, 0)),    # all hiddens
                pl.BlockSpec((B, H), lambda c: (0, 0)),          # final hidden
            ],
            scratch_shapes=[pltpu.VMEM((B, H), jnp.float32)],
        ),
        compiler_params=pltpu.CompilerParams(
            dimension_semantics=("arbitrary",),   # recurrence must be sequential
        ),
    )(emb, h0[0], w_cat, b_cat)

    # ---- pooling + log_softmax: dense, parallel over rows -------------------
    h_flat = h_all.reshape(S * B, H)
    RB = _choose_row_block(S * B)

    logp = pl.pallas_call(
        pool_logsoftmax_kernel,
        out_shape=jax.ShapeDtypeStruct((S * B, V), jnp.float32),
        grid_spec=pltpu.PrefetchScalarGridSpec(
            num_scalar_prefetch=0,
            grid=(S * B // RB,),
            in_specs=[
                pl.BlockSpec((RB, H), lambda r: (r, 0)),
                pl.BlockSpec((H, V), lambda r: (0, 0)),
                pl.BlockSpec((1, V), lambda r: (0, 0)),
            ],
            out_specs=pl.BlockSpec((RB, V), lambda r: (r, 0)),
        ),
        compiler_params=pltpu.CompilerParams(
            dimension_semantics=("parallel",),    # megacore-shardable
        ),
    )(h_flat, w_pool_t, b_pool2)

    # pooled.view(-1, vocab_size) ordering is already (S*B, V)
    return logp, h_final[None]


# --------------------------------------------------------------------------- reference
def rnn_lm_reference(emb, h0, w_ih, w_hh, b_ih, b_hh, w_pool, b_pool):
    S, B, E = emb.shape
    V = w_pool.shape[0]

    def step(h, x):
        h_new = jnp.tanh(x @ w_ih.T + b_ih + h @ w_hh.T + b_hh)
        return h_new, h_new

    h_last, outs = jax.lax.scan(step, h0[0], emb)          # outs: (S, B, H)
    logits = (outs @ w_pool.T + b_pool).reshape(S * B, V)
    logp = jax.nn.log_softmax(logits, axis=1)
    return logp, h_last[None]


# --------------------------------------------------------------------------- main
if __name__ == "__main__":
    # small config consistent with the module's __init__, picked at TPU-friendly
    # (8, 128)-granular sizes so vregs / MXU rows are actually filled.
    vocab_size = 128
    in_embedding_dim = 128
    n_hidden = 128
    n_layers = 1            # implemented: single-layer unidirectional elman RNN
    seq_len = 16
    batch = 8

    key = jax.random.PRNGKey(0)
    k_emb, k_pool, k_wih, k_whh, k_bih, k_bhh, k_tok = jax.random.split(key, 7)

    initrange = 0.1
    # init_weights(): embedding & pooling uniform(-0.1, 0.1), pooling bias zeros
    emb_table = jax.random.uniform(
        k_emb, (vocab_size, in_embedding_dim), jnp.float32, -initrange, initrange)
    w_pool = jax.random.uniform(
        k_pool, (vocab_size, n_hidden), jnp.float32, -initrange, initrange)
    b_pool = jnp.zeros((vocab_size,), jnp.float32)

    # nn.RNN default init: uniform(-1/sqrt(hidden), 1/sqrt(hidden))
    stdv = 1.0 / (n_hidden ** 0.5)
    w_ih = jax.random.uniform(
        k_wih, (n_hidden, in_embedding_dim), jnp.float32, -stdv, stdv)
    w_hh = jax.random.uniform(k_whh, (n_hidden, n_hidden), jnp.float32, -stdv, stdv)
    b_ih = jax.random.uniform(k_bih, (n_hidden,), jnp.float32, -stdv, stdv)
    b_hh = jax.random.uniform(k_bhh, (n_hidden,), jnp.float32, -stdv, stdv)

    # example inputs: token ids (seq, batch), init_hidden -> zeros
    tokens = jax.random.randint(k_tok, (seq_len, batch), 0, vocab_size, jnp.int32)
    h0 = jnp.zeros((n_layers, batch, n_hidden), jnp.float32)

    # glue: embedding lookup (+ eval-mode dropout == identity)
    emb = jnp.take(emb_table, tokens, axis=0)   # (S, B, E)

    logp, h_final = rnn_lm_forward(emb, h0, w_ih, w_hh, b_ih, b_hh, w_pool, b_pool)
    logp = jax.block_until_ready(logp)
    h_final = jax.block_until_ready(h_final)

    # correctness check against a pure-JAX reference
    logp_ref, h_ref = rnn_lm_reference(emb, h0, w_ih, w_hh, b_ih, b_hh, w_pool, b_pool)
    assert logp.shape == (seq_len * batch, vocab_size)
    assert h_final.shape == (n_layers, batch, n_hidden)
    assert jnp.allclose(logp, logp_ref, atol=1e-3, rtol=1e-3)
    assert jnp.allclose(h_final, h_ref, atol=1e-3, rtol=1e-3)

    print("KERNEL_OK")
</pallas_src>

<mosaic_0001>
module attributes {stable_mosaic.version = 11 : i64} {
  func.func @pool_logsoftmax_kernel(%arg0: i32, %arg1: memref<128x128xf32, #tpu.memory_space<vmem>>, %arg2: memref<128x128xf32, #tpu.memory_space<vmem>>, %arg3: memref<1x128xf32, #tpu.memory_space<vmem>>, %arg4: memref<128x128xf32, #tpu.memory_space<vmem>>) attributes {dimension_semantics = [#tpu.dimension_semantics<parallel>], iteration_bounds = array<i64: 1>, scalar_prefetch = 0 : i64, scratch_operands = 0 : i64, tpu.core_type = #tpu.core_type<tc>, window_params = [{transform_indices = @transform_0, window_bounds = array<i64: 128, 128>}, {pipeline_mode = #tpu.pipeline_mode<synchronous>, transform_indices = @transform_1, window_bounds = array<i64: 128, 128>}, {pipeline_mode = #tpu.pipeline_mode<synchronous>, transform_indices = @transform_2, window_bounds = array<i64: 1, 128>}, {transform_indices = @transform_3, window_bounds = array<i64: 128, 128>}]} {
    %c0 = arith.constant 0 : index
    %c0_0 = arith.constant 0 : index
    %0 = vector.load %arg1[%c0, %c0_0] : memref<128x128xf32, #tpu.memory_space<vmem>>, vector<128x128xf32>
    %c0_1 = arith.constant 0 : index
    %c0_2 = arith.constant 0 : index
    %1 = vector.load %arg2[%c0_1, %c0_2] : memref<128x128xf32, #tpu.memory_space<vmem>>, vector<128x128xf32>
    %cst = arith.constant dense<0.000000e+00> : vector<128x128xf32>
    %2 = tpu.matmul %0, %1, %cst {dimension_numbers = #tpu.dot_dimension_numbers<[1], [0], [0], [1], [0, 0, 1, 1], [], []>} : vector<128x128xf32>, vector<128x128xf32>, vector<128x128xf32> -> vector<128x128xf32>
    %c0_3 = arith.constant 0 : index
    %c0_4 = arith.constant 0 : index
    %3 = vector.load %arg3[%c0_3, %c0_4] : memref<1x128xf32, #tpu.memory_space<vmem>>, vector<1x128xf32>
    %4 = vector.broadcast %3 : vector<1x128xf32> to vector<128x128xf32>
    %5 = arith.addf %2, %4 : vector<128x128xf32>
    %cst_5 = arith.constant dense<0xFF800000> : vector<128xf32>
    %6 = vector.multi_reduction <maximumf>, %5, %cst_5 [1] : vector<128x128xf32> to vector<128xf32>
    %7 = vector.shape_cast %6 : vector<128xf32> to vector<128x1xf32>
    %8 = vector.broadcast %7 : vector<128x1xf32> to vector<128x128xf32>
    %9 = arith.subf %5, %8 : vector<128x128xf32>
    %10 = math.exp %9 : vector<128x128xf32>
    %cst_6 = arith.constant dense<0.000000e+00> : vector<128xf32>
    %11 = vector.multi_reduction <add>, %10, %cst_6 [1] : vector<128x128xf32> to vector<128xf32>
    %12 = vector.shape_cast %11 : vector<128xf32> to vector<128x1xf32>
    %13 = math.log %12 : vector<128x1xf32>
    %14 = vector.broadcast %13 : vector<128x1xf32> to vector<128x128xf32>
    %15 = arith.subf %9, %14 : vector<128x128xf32>
    %c0_7 = arith.constant 0 : index
    %c0_8 = arith.constant 0 : index
    %16 = vector.load %arg4[%c0_7, %c0_8] : memref<128x128xf32, #tpu.memory_space<vmem>>, vector<128x128xf32>
    tpu.vector_store %arg4[%c0_7, %c0_8], %15 {strides = array<i32>} : memref<128x128xf32, #tpu.memory_space<vmem>>, vector<128x128xf32>,
    return
  }
  func.func @transform_0(%arg0: i32) -> (i32, i32) {
    %c0_i32 = arith.constant 0 : i32
    %c0_i32_0 = arith.constant 0 : i32
    return %arg0, %c0_i32 : i32, i32
  }
  func.func @transform_1(%arg0: i32) -> (i32, i32) {
    %c0_i32 = arith.constant 0 : i32
    %c0_i32_0 = arith.constant 0 : i32
    %c0_i32_1 = arith.constant 0 : i32
    return %c0_i32, %c0_i32_0 : i32, i32
  }
  func.func @transform_2(%arg0: i32) -> (i32, i32) {
    %c0_i32 = arith.constant 0 : i32
    %c0_i32_0 = arith.constant 0 : i32
    %c0_i32_1 = arith.constant 0 : i32
    return %c0_i32, %c0_i32_0 : i32, i32
  }
  func.func @transform_3(%arg0: i32) -> (i32, i32) {
    %c0_i32 = arith.constant 0 : i32
    %c0_i32_0 = arith.constant 0 : i32
    return %arg0, %c0_i32 : i32, i32
  }
}

module attributes {stable_mosaic.version = 11 : i64} {
  func.func @rnn_recurrence_kernel(%arg0: i32, %arg1: memref<16x8x128xf32, #tpu.memory_space<vmem>>, %arg2: memref<8x128xf32, #tpu.memory_space<vmem>>, %arg3: memref<256x128xf32, #tpu.memory_space<vmem>>, %arg4: memref<1x128xf32, #tpu.memory_space<vmem>>, %arg5: memref<16x8x128xf32, #tpu.memory_space<vmem>>, %arg6: memref<8x128xf32, #tpu.memory_space<vmem>>, %arg7: memref<8x128xf32, #tpu.memory_space<vmem>>) attributes {dimension_semantics = [#tpu.dimension_semantics<arbitrary>], iteration_bounds = array<i64: 1>, scalar_prefetch = 0 : i64, scratch_operands = 1 : i64, tpu.core_type = #tpu.core_type<tc>, window_params = [{transform_indices = @transform_0, window_bounds = array<i64: 16, 8, 128>}, {pipeline_mode = #tpu.pipeline_mode<synchronous>, transform_indices = @transform_1, window_bounds = array<i64: 8, 128>}, {pipeline_mode = #tpu.pipeline_mode<synchronous>, transform_indices = @transform_2, window_bounds = array<i64: 256, 128>}, {pipeline_mode = #tpu.pipeline_mode<synchronous>, transform_indices = @transform_3, window_bounds = array<i64: 1, 128>}, {transform_indices = @transform_4, window_bounds = array<i64: 16, 8, 128>}, {pipeline_mode = #tpu.pipeline_mode<synchronous>, transform_indices = @transform_5, window_bounds = array<i64: 8, 128>}]} {
    %c0_i32 = arith.constant 0 : i32
    %0 = arith.cmpi eq, %arg0, %c0_i32 : i32
    %1 = arith.extui %0 : i1 to i32
    %c0_i32_0 = arith.constant 0 : i32
    %2 = arith.cmpi ne, %1, %c0_i32_0 : i32
    scf.if %2 {
      %c0_150 = arith.constant 0 : index
      %c0_151 = arith.constant 0 : index
      %232 = vector.load %arg2[%c0_150, %c0_151] : memref<8x128xf32, #tpu.memory_space<vmem>>, vector<8x128xf32>
      %c0_152 = arith.constant 0 : index
      %c0_153 = arith.constant 0 : index
      %233 = vector.load %arg7[%c0_152, %c0_153] : memref<8x128xf32, #tpu.memory_space<vmem>>, vector<8x128xf32>
      tpu.vector_store %arg7[%c0_152, %c0_153], %232 {strides = array<i32>} : memref<8x128xf32, #tpu.memory_space<vmem>>, vector<8x128xf32>,
    } else {
    }
    %c0 = arith.constant 0 : index
    %c0_1 = arith.constant 0 : index
    %3 = vector.load %arg7[%c0, %c0_1] : memref<8x128xf32, #tpu.memory_space<vmem>>, vector<8x128xf32>
    %c0_i32_2 = arith.constant 0 : i32
    %4 = arith.index_cast %c0_i32_2 : i32 to index
    %c0_3 = arith.constant 0 : index
    %c0_4 = arith.constant 0 : index
    %5 = vector.load %arg1[%4, %c0_3, %c0_4] : memref<16x8x128xf32, #tpu.memory_space<vmem>>, vector<1x8x128xf32>
    %6 = vector.shape_cast %5 : vector<1x8x128xf32> to vector<8x128xf32>
    %7 = tpu.concatenate %6, %3 in 1 : vector<8x128xf32>, vector<8x128xf32> -> vector<8x256xf32>
    %c0_5 = arith.constant 0 : index
    %c0_6 = arith.constant 0 : index
    %8 = vector.load %arg3[%c0_5, %c0_6] : memref<256x128xf32, #tpu.memory_space<vmem>>, vector<256x128xf32>
    %cst = arith.constant dense<0.000000e+00> : vector<8x128xf32>
    %9 = tpu.matmul %7, %8, %cst {dimension_numbers = #tpu.dot_dimension_numbers<[1], [0], [0], [1], [0, 0, 1, 1], [], []>} : vector<8x256xf32>, vector<256x128xf32>, vector<8x128xf32> -> vector<8x128xf32>
    %c0_7 = arith.constant 0 : index
    %c0_8 = arith.constant 0 : index
    %10 = vector.load %arg4[%c0_7, %c0_8] : memref<1x128xf32, #tpu.memory_space<vmem>>, vector<1x128xf32>
    %11 = vector.broadcast %10 : vector<1x128xf32> to vector<8x128xf32>
    %12 = arith.addf %9, %11 : vector<8x128xf32>
    %13 = math.tanh %12 : vector<8x128xf32>
    %14 = arith.index_cast %c0_i32_2 : i32 to index
    %c0_9 = arith.constant 0 : index
    %c0_10 = arith.constant 0 : index
    %15 = vector.load %arg5[%14, %c0_9, %c0_10] : memref<16x8x128xf32, #tpu.memory_space<vmem>>, vector<1x8x128xf32>
    %16 = vector.shape_cast %15 : vector<1x8x128xf32> to vector<8x128xf32>
    %17 = vector.shape_cast %13 : vector<8x128xf32> to vector<1x8x128xf32>
    tpu.vector_store %arg5[%14, %c0_9, %c0_10], %17 {strides = array<i32>} : memref<16x8x128xf32, #tpu.memory_space<vmem>>, vector<1x8x128xf32>,
    %c1_i32 = arith.constant 1 : i32
    %18 = arith.index_cast %c1_i32 : i32 to index
    %c0_11 = arith.constant 0 : index
    %c0_12 = arith.constant 0 : index
    %19 = vector.load %arg1[%18, %c0_11, %c0_12] : memref<16x8x128xf32, #tpu.memory_space<vmem>>, vector<1x8x128xf32>
    %20 = vector.shape_cast %19 : vector<1x8x128xf32> to vector<8x128xf32>
    %21 = tpu.concatenate %20, %13 in 1 : vector<8x128xf32>, vector<8x128xf32> -> vector<8x256xf32>
    %c0_13 = arith.constant 0 : index
    %c0_14 = arith.constant 0 : index
    %22 = vector.load %arg3[%c0_13, %c0_14] : memref<256x128xf32, #tpu.memory_space<vmem>>, vector<256x128xf32>
    %cst_15 = arith.constant dense<0.000000e+00> : vector<8x128xf32>
    %23 = tpu.matmul %21, %22, %cst_15 {dimension_numbers = #tpu.dot_dimension_numbers<[1], [0], [0], [1], [0, 0, 1, 1], [], []>} : vector<8x256xf32>, vector<256x128xf32>, vector<8x128xf32> -> vector<8x128xf32>
    %c0_16 = arith.constant 0 : index
    %c0_17 = arith.constant 0 : index
    %24 = vector.load %arg4[%c0_16, %c0_17] : memref<1x128xf32, #tpu.memory_space<vmem>>, vector<1x128xf32>
    %25 = vector.broadcast %24 : vector<1x128xf32> to vector<8x128xf32>
    %26 = arith.addf %23, %25 : vector<8x128xf32>
    %27 = math.tanh %26 : vector<8x128xf32>
    %28 = arith.index_cast %c1_i32 : i32 to index
    %c0_18 = arith.constant 0 : index
    %c0_19 = arith.constant 0 : index
    %29 = vector.load %arg5[%28, %c0_18, %c0_19] : memref<16x8x128xf32, #tpu.memory_space<vmem>>, vector<1x8x128xf32>
    %30 = vector.shape_cast %29 : vector<1x8x128xf32> to vector<8x128xf32>
    %31 = vector.shape_cast %27 : vector<8x128xf32> to vector<1x8x128xf32>
    tpu.vector_store %arg5[%28, %c0_18, %c0_19], %31 {strides = array<i32>} : memref<16x8x128xf32, #tpu.memory_space<vmem>>, vector<1x8x128xf32>,
    %c2_i32 = arith.constant 2 : i32
    %32 = arith.index_cast %c2_i32 : i32 to index
    %c0_20 = arith.constant 0 : index
    %c0_21 = arith.constant 0 : index
    %33 = vector.load %arg1[%32, %c0_20, %c0_21] : memref<16x8x128xf32, #tpu.memory_space<vmem>>, vector<1x8x128xf32>
    %34 = vector.shape_cast %33 : vector<1x8x128xf32> to vector<8x128xf32>
    %35 = tpu.concatenate %34, %27 in 1 : vector<8x128xf32>, vector<8x128xf32> -> vector<8x256xf32>
    %c0_22 = arith.constant 0 : index
    %c0_23 = arith.constant 0 : index
    %36 = vector.load %arg3[%c0_22, %c0_23] : memref<256x128xf32, #tpu.memory_space<vmem>>, vector<256x128xf32>
    %cst_24 = arith.constant dense<0.000000e+00> : vector<8x128xf32>
    %37 = tpu.matmul %35, %36, %cst_24 {dimension_numbers = #tpu.dot_dimension_numbers<[1], [0], [0], [1], [0, 0, 1, 1], [], []>} : vector<8x256xf32>, vector<256x128xf32>, vector<8x128xf32> -> vector<8x128xf32>
    %c0_25 = arith.constant 0 : index
    %c0_26 = arith.constant 0 : index
    %38 = vector.load %arg4[%c0_25, %c0_26] : memref<1x128xf32, #tpu.memory_space<vmem>>, vector<1x128xf32>
    %39 = vector.broadcast %38 : vector<1x128xf32> to vector<8x128xf32>
    %40 = arith.addf %37, %39 : vector<8x128xf32>
    %41 = math.tanh %40 : vector<8x128xf32>
    %42 = arith.index_cast %c2_i32 : i32 to index
    %c0_27 = arith.constant 0 : index
    %c0_28 = arith.constant 0 : index
    %43 = vector.load %arg5[%42, %c0_27, %c0_28] : memref<16x8x128xf32, #tpu.memory_space<vmem>>, vector<1x8x128xf32>
    %44 = vector.shape_cast %43 : vector<1x8x128xf32> to vector<8x128xf32>
    %45 = vector.shape_cast %41 : vector<8x128xf32> to vector<1x8x128xf32>
    tpu.vector_store %arg5[%42, %c0_27, %c0_28], %45 {strides = array<i32>} : memref<16x8x128xf32, #tpu.memory_space<vmem>>, vector<1x8x128xf32>,
    %c3_i32 = arith.constant 3 : i32
    %46 = arith.index_cast %c3_i32 : i32 to index
    %c0_29 = arith.constant 0 : index
    %c0_30 = arith.constant 0 : index
    %47 = vector.load %arg1[%46, %c0_29, %c0_30] : memref<16x8x128xf32, #tpu.memory_space<vmem>>, vector<1x8x128xf32>
    %48 = vector.shape_cast %47 : vector<1x8x128xf32> to vector<8x128xf32>
    %49 = tpu.concatenate %48, %41 in 1 : vector<8x128xf32>, vector<8x128xf32> -> vector<8x256xf32>
    %c0_31 = arith.constant 0 : index
    %c0_32 = arith.constant 0 : index
    %50 = vector.load %arg3[%c0_31, %c0_32] : memref<256x128xf32, #tpu.memory_space<vmem>>, vector<256x128xf32>
    %cst_33 = arith.constant dense<0.000000e+00> : vector<8x128xf32>
    %51 = tpu.matmul %49, %50, %cst_33 {dimension_numbers = #tpu.dot_dimension_numbers<[1], [0], [0], [1], [0, 0, 1, 1], [], []>} : vector<8x256xf32>, vector<256x128xf32>, vector<8x128xf32> -> vector<8x128xf32>
    %c0_34 = arith.constant 0 : index
    %c0_35 = arith.constant 0 : index
    %52 = vector.load %arg4[%c0_34, %c0_35] : memref<1x128xf32, #tpu.memory_space<vmem>>, vector<1x128xf32>
    %53 = vector.broadcast %52 : vector<1x128xf32> to vector<8x128xf32>
    %54 = arith.addf %51, %53 : vector<8x128xf32>
    %55 = math.tanh %54 : vector<8x128xf32>
    %56 = arith.index_cast %c3_i32 : i32 to index
    %c0_36 = arith.constant 0 : index
    %c0_37 = arith.constant 0 : index
    %57 = vector.load %arg5[%56, %c0_36, %c0_37] : memref<16x8x128xf32, #tpu.memory_space<vmem>>, vector<1x8x128xf32>
    %58 = vector.shape_cast %57 : vector<1x8x128xf32> to vector<8x128xf32>
    %59 = vector.shape_cast %55 : vector<8x128xf32> to vector<1x8x128xf32>
    tpu.vector_store %arg5[%56, %c0_36, %c0_37], %59 {strides = array<i32>} : memref<16x8x128xf32, #tpu.memory_space<vmem>>, vector<1x8x128xf32>,
    %c4_i32 = arith.constant 4 : i32
    %60 = arith.index_cast %c4_i32 : i32 to index
    %c0_38 = arith.constant 0 : index
    %c0_39 = arith.constant 0 : index
    %61 = vector.load %arg1[%60, %c0_38, %c0_39] : memref<16x8x128xf32, #tpu.memory_space<vmem>>, vector<1x8x128xf32>
    %62 = vector.shape_cast %61 : vector<1x8x128xf32> to vector<8x128xf32>
    %63 = tpu.concatenate %62, %55 in 1 : vector<8x128xf32>, vector<8x128xf32> -> vector<8x256xf32>
    %c0_40 = arith.constant 0 : index
    %c0_41 = arith.constant 0 : index
    %64 = vector.load %arg3[%c0_40, %c0_41] : memref<256x128xf32, #tpu.memory_space<vmem>>, vector<256x128xf32>
    %cst_42 = arith.constant dense<0.000000e+00> : vector<8x128xf32>
    %65 = tpu.matmul %63, %64, %cst_42 {dimension_numbers = #tpu.dot_dimension_numbers<[1], [0], [0], [1], [0, 0, 1, 1], [], []>} : vector<8x256xf32>, vector<256x128xf32>, vector<8x128xf32> -> vector<8x128xf32>
    %c0_43 = arith.constant 0 : index
    %c0_44 = arith.constant 0 : index
    %66 = vector.load %arg4[%c0_43, %c0_44] : memref<1x128xf32, #tpu.memory_space<vmem>>, vector<1x128xf32>
    %67 = vector.broadcast %66 : vector<1x128xf32> to vector<8x128xf32>
    %68 = arith.addf %65, %67 : vector<8x128xf32>
    %69 = math.tanh %68 : vector<8x128xf32>
    %70 = arith.index_cast %c4_i32 : i32 to index
    %c0_45 = arith.constant 0 : index
    %c0_46 = arith.constant 0 : index
    %71 = vector.load %arg5[%70, %c0_45, %c0_46] : memref<16x8x128xf32, #tpu.memory_space<vmem>>, vector<1x8x128xf32>
    %72 = vector.shape_cast %71 : vector<1x8x128xf32> to vector<8x128xf32>
    %73 = vector.shape_cast %69 : vector<8x128xf32> to vector<1x8x128xf32>
    tpu.vector_store %arg5[%70, %c0_45, %c0_46], %73 {strides = array<i32>} : memref<16x8x128xf32, #tpu.memory_space<vmem>>, vector<1x8x128xf32>,
    %c5_i32 = arith.constant 5 : i32
    %74 = arith.index_cast %c5_i32 : i32 to index
    %c0_47 = arith.constant 0 : index
    %c0_48 = arith.constant 0 : index
    %75 = vector.load %arg1[%74, %c0_47, %c0_48] : memref<16x8x128xf32, #tpu.memory_space<vmem>>, vector<1x8x128xf32>
    %76 = vector.shape_cast %75 : vector<1x8x128xf32> to vector<8x128xf32>
    %77 = tpu.concatenate %76, %69 in 1 : vector<8x128xf32>, vector<8x128xf32> -> vector<8x256xf32>
    %c0_49 = arith.constant 0 : index
    %c0_50 = arith.constant 0 : index
    %78 = vector.load %arg3[%c0_49, %c0_50] : memref<256x128xf32, #tpu.memory_space<vmem>>, vector<256x128xf32>
    %cst_51 = arith.constant dense<0.000000e+00> : vector<8x128xf32>
    %79 = tpu.matmul %77, %78, %cst_51 {dimension_numbers = #tpu.dot_dimension_numbers<[1], [0], [0], [1], [0, 0, 1, 1], [], []>} : vector<8x256xf32>, vector<256x128xf32>, vector<8x128xf32> -> vector<8x128xf32>
    %c0_52 = arith.constant 0 : index
    %c0_53 = arith.constant 0 : index
    %80 = vector.load %arg4[%c0_52, %c0_53] : memref<1x128xf32, #tpu.memory_space<vmem>>, vector<1x128xf32>
    %81 = vector.broadcast %80 : vector<1x128xf32> to vector<8x128xf32>
    %82 = arith.addf %79, %81 : vector<8x128xf32>
    %83 = math.tanh %82 : vector<8x128xf32>
    %84 = arith.index_cast %c5_i32 : i32 to index
    %c0_54 = arith.constant 0 : index
    %c0_55 = arith.constant 0 : index
    %85 = vector.load %arg5[%84, %c0_54, %c0_55] : memref<16x8x128xf32, #tpu.memory_space<vmem>>, vector<1x8x128xf32>
    %86 = vector.shape_cast %85 : vector<1x8x128xf32> to vector<8x128xf32>
    %87 = vector.shape_cast %83 : vector<8x128xf32> to vector<1x8x128xf32>
    tpu.vector_store %arg5[%84, %c0_54, %c0_55], %87 {strides = array<i32>} : memref<16x8x128xf32, #tpu.memory_space<vmem>>, vector<1x8x128xf32>,
    %c6_i32 = arith.constant 6 : i32
    %88 = arith.index_cast %c6_i32 : i32 to index
    %c0_56 = arith.constant 0 : index
    %c0_57 = arith.constant 0 : index
    %89 = vector.load %arg1[%88, %c0_56, %c0_57] : memref<16x8x128xf32, #tpu.memory_space<vmem>>, vector<1x8x128xf32>
    %90 = vector.shape_cast %89 : vector<1x8x128xf32> to vector<8x128xf32>
    %91 = tpu.concatenate %90, %83 in 1 : vector<8x128xf32>, vector<8x128xf32> -> vector<8x256xf32>
    %c0_58 = arith.constant 0 : index
    %c0_59 = arith.constant 0 : index
    %92 = vector.load %arg3[%c0_58, %c0_59] : memref<256x128xf32, #tpu.memory_space<vmem>>, vector<256x128xf32>
    %cst_60 = arith.constant dense<0.000000e+00> : vector<8x128xf32>
    %93 = tpu.matmul %91, %92, %cst_60 {dimension_numbers = #tpu.dot_dimension_numbers<[1], [0], [0], [1], [0, 0, 1, 1], [], []>} : vector<8x256xf32>, vector<256x128xf32>, vector<8x128xf32> -> vector<8x128xf32>
    %c0_61 = arith.constant 0 : index
    %c0_62 = arith.constant 0 : index
    %94 = vector.load %arg4[%c0_61, %c0_62] : memref<1x128xf32, #tpu.memory_space<vmem>>, vector<1x128xf32>
    %95 = vector.broadcast %94 : vector<1x128xf32> to vector<8x128xf32>
    %96 = arith.addf %93, %95 : vector<8x128xf32>
    %97 = math.tanh %96 : vector<8x128xf32>
    %98 = arith.index_cast %c6_i32 : i32 to index
    %c0_63 = arith.constant 0 : index
    %c0_64 = arith.constant 0 : index
    %99 = vector.load %arg5[%98, %c0_63, %c0_64] : memref<16x8x128xf32, #tpu.memory_space<vmem>>, vector<1x8x128xf32>
    %100 = vector.shape_cast %99 : vector<1x8x128xf32> to vector<8x128xf32>
    %101 = vector.shape_cast %97 : vector<8x128xf32> to vector<1x8x128xf32>
    tpu.vector_store %arg5[%98, %c0_63, %c0_64], %101 {strides = array<i32>} : memref<16x8x128xf32, #tpu.memory_space<vmem>>, vector<1x8x128xf32>,
    %c7_i32 = arith.constant 7 : i32
    %102 = arith.index_cast %c7_i32 : i32 to index
    %c0_65 = arith.constant 0 : index
    %c0_66 = arith.constant 0 : index
    %103 = vector.load %arg1[%102, %c0_65, %c0_66] : memref<16x8x128xf32, #tpu.memory_space<vmem>>, vector<1x8x128xf32>
    %104 = vector.shape_cast %103 : vector<1x8x128xf32> to vector<8x128xf32>
    %105 = tpu.concatenate %104, %97 in 1 : vector<8x128xf32>, vector<8x128xf32> -> vector<8x256xf32>
    %c0_67 = arith.constant 0 : index
    %c0_68 = arith.constant 0 : index
    %106 = vector.load %arg3[%c0_67, %c0_68] : memref<256x128xf32, #tpu.memory_space<vmem>>, vector<256x128xf32>
    %cst_69 = arith.constant dense<0.000000e+00> : vector<8x128xf32>
    %107 = tpu.matmul %105, %106, %cst_69 {dimension_numbers = #tpu.dot_dimension_numbers<[1], [0], [0], [1], [0, 0, 1, 1], [], []>} : vector<8x256xf32>, vector<256x128xf32>, vector<8x128xf32> -> vector<8x128xf32>
    %c0_70 = arith.constant 0 : index
    %c0_71 = arith.constant 0 : index
    %108 = vector.load %arg4[%c0_70, %c0_71] : memref<1x128xf32, #tpu.memory_space<vmem>>, vector<1x128xf32>
    %109 = vector.broadcast %108 : vector<1x128xf32> to vector<8x128xf32>
    %110 = arith.addf %107, %109 : vector<8x128xf32>
    %111 = math.tanh %110 : vector<8x128xf32>
    %112 = arith.index_cast %c7_i32 : i32 to index
    %c0_72 = arith.constant 0 : index
    %c0_73 = arith.constant 0 : index
    %113 = vector.load %arg5[%112, %c0_72, %c0_73] : memref<16x8x128xf32, #tpu.memory_space<vmem>>, vector<1x8x128xf32>
    %114 = vector.shape_cast %113 : vector<1x8x128xf32> to vector<8x128xf32>
    %115 = vector.shape_cast %111 : vector<8x128xf32> to vector<1x8x128xf32>
    tpu.vector_store %arg5[%112, %c0_72, %c0_73], %115 {strides = array<i32>} : memref<16x8x128xf32, #tpu.memory_space<vmem>>, vector<1x8x128xf32>,
    %c8_i32 = arith.constant 8 : i32
    %116 = arith.index_cast %c8_i32 : i32 to index
    %c0_74 = arith.constant 0 : index
    %c0_75 = arith.constant 0 : index
    %117 = vector.load %arg1[%116, %c0_74, %c0_75] : memref<16x8x128xf32, #tpu.memory_space<vmem>>, vector<1x8x128xf32>
    %118 = vector.shape_cast %117 : vector<1x8x128xf32> to vector<8x128xf32>
    %119 = tpu.concatenate %118, %111 in 1 : vector<8x128xf32>, vector<8x128xf32> -> vector<8x256xf32>
    %c0_76 = arith.constant 0 : index
    %c0_77 = arith.constant 0 : index
    %120 = vector.load %arg3[%c0_76, %c0_77] : memref<256x128xf32, #tpu.memory_space<vmem>>, vector<256x128xf32>
    %cst_78 = arith.constant dense<0.000000e+00> : vector<8x128xf32>
    %121 = tpu.matmul %119, %120, %cst_78 {dimension_numbers = #tpu.dot_dimension_numbers<[1], [0], [0], [1], [0, 0, 1, 1], [], []>} : vector<8x256xf32>, vector<256x128xf32>, vector<8x128xf32> -> vector<8x128xf32>
    %c0_79 = arith.constant 0 : index
    %c0_80 = arith.constant 0 : index
    %122 = vector.load %arg4[%c0_79, %c0_80] : memref<1x128xf32, #tpu.memory_space<vmem>>, vector<1x128xf32>
    %123 = vector.broadcast %122 : vector<1x128xf32> to vector<8x128xf32>
    %124 = arith.addf %121, %123 : vector<8x128xf32>
    %125 = math.tanh %124 : vector<8x128xf32>
    %126 = arith.index_cast %c8_i32 : i32 to index
    %c0_81 = arith.constant 0 : index
    %c0_82 = arith.constant 0 : index
    %127 = vector.load %arg5[%126, %c0_81, %c0_82] : memref<16x8x128xf32, #tpu.memory_space<vmem>>, vector<1x8x128xf32>
    %128 = vector.shape_cast %127 : vector<1x8x128xf32> to vector<8x128xf32>
    %129 = vector.shape_cast %125 : vector<8x128xf32> to vector<1x8x128xf32>
    tpu.vector_store %arg5[%126, %c0_81, %c0_82], %129 {strides = array<i32>} : memref<16x8x128xf32, #tpu.memory_space<vmem>>, vector<1x8x128xf32>,
    %c9_i32 = arith.constant 9 : i32
    %130 = arith.index_cast %c9_i32 : i32 to index
    %c0_83 = arith.constant 0 : index
    %c0_84 = arith.constant 0 : index
    %131 = vector.load %arg1[%130, %c0_83, %c0_84] : memref<16x8x128xf32, #tpu.memory_space<vmem>>, vector<1x8x128xf32>
    %132 = vector.shape_cast %131 : vector<1x8x128xf32> to vector<8x128xf32>
    %133 = tpu.concatenate %132, %125 in 1 : vector<8x128xf32>, vector<8x128xf32> -> vector<8x256xf32>
    %c0_85 = arith.constant 0 : index
    %c0_86 = arith.constant 0 : index
    %134 = vector.load %arg3[%c0_85, %c0_86] : memref<256x128xf32, #tpu.memory_space<vmem>>, vector<256x128xf32>
    %cst_87 = arith.constant dense<0.000000e+00> : vector<8x128xf32>
    %135 = tpu.matmul %133, %134, %cst_87 {dimension_numbers = #tpu.dot_dimension_numbers<[1], [0], [0], [1], [0, 0, 1, 1], [], []>} : vector<8x256xf32>, vector<256x128xf32>, vector<8x128xf32> -> vector<8x128xf32>
    %c0_88 = arith.constant 0 : index
    %c0_89 = arith.constant 0 : index
    %136 = vector.load %arg4[%c0_88, %c0_89] : memref<1x128xf32, #tpu.memory_space<vmem>>, vector<1x128xf32>
    %137 = vector.broadcast %136 : vector<1x128xf32> to vector<8x128xf32>
    %138 = arith.addf %135, %137 : vector<8x128xf32>
    %139 = math.tanh %138 : vector<8x128xf32>
    %140 = arith.index_cast %c9_i32 : i32 to index
    %c0_90 = arith.constant 0 : index
    %c0_91 = arith.constant 0 : index
    %141 = vector.load %arg5[%140, %c0_90, %c0_91] : memref<16x8x128xf32, #tpu.memory_space<vmem>>, vector<1x8x128xf32>
    %142 = vector.shape_cast %141 : vector<1x8x128xf32> to vector<8x128xf32>
    %143 = vector.shape_cast %139 : vector<8x128xf32> to vector<1x8x128xf32>
    tpu.vector_store %arg5[%140, %c0_90, %c0_91], %143 {strides = array<i32>} : memref<16x8x128xf32, #tpu.memory_space<vmem>>, vector<1x8x128xf32>,
    %c10_i32 = arith.constant 10 : i32
    %144 = arith.index_cast %c10_i32 : i32 to index
    %c0_92 = arith.constant 0 : index
    %c0_93 = arith.constant 0 : index
    %145 = vector.load %arg1[%144, %c0_92, %c0_93] : memref<16x8x128xf32, #tpu.memory_space<vmem>>, vector<1x8x128xf32>
    %146 = vector.shape_cast %145 : vector<1x8x128xf32> to vector<8x128xf32>
    %147 = tpu.concatenate %146, %139 in 1 : vector<8x128xf32>, vector<8x128xf32> -> vector<8x256xf32>
    %c0_94 = arith.constant 0 : index
    %c0_95 = arith.constant 0 : index
    %148 = vector.load %arg3[%c0_94, %c0_95] : memref<256x128xf32, #tpu.memory_space<vmem>>, vector<256x128xf32>
    %cst_96 = arith.constant dense<0.000000e+00> : vector<8x128xf32>
    %149 = tpu.matmul %147, %148, %cst_96 {dimension_numbers = #tpu.dot_dimension_numbers<[1], [0], [0], [1], [0, 0, 1, 1], [], []>} : vector<8x256xf32>, vector<256x128xf32>, vector<8x128xf32> -> vector<8x128xf32>
    %c0_97 = arith.constant 0 : index
    %c0_98 = arith.constant 0 : index
    %150 = vector.load %arg4[%c0_97, %c0_98] : memref<1x128xf32, #tpu.memory_space<vmem>>, vector<1x128xf32>
    %151 = vector.broadcast %150 : vector<1x128xf32> to vector<8x128xf32>
    %152 = arith.addf %149, %151 : vector<8x128xf32>
    %153 = math.tanh %152 : vector<8x128xf32>
    %154 = arith.index_cast %c10_i32 : i32 to index
    %c0_99 = arith.constant 0 : index
    %c0_100 = arith.constant 0 : index
    %155 = vector.load %arg5[%154, %c0_99, %c0_100] : memref<16x8x128xf32, #tpu.memory_space<vmem>>, vector<1x8x128xf32>
    %156 = vector.shape_cast %155 : vector<1x8x128xf32> to vector<8x128xf32>
    %157 = vector.shape_cast %153 : vector<8x128xf32> to vector<1x8x128xf32>
    tpu.vector_store %arg5[%154, %c0_99, %c0_100], %157 {strides = array<i32>} : memref<16x8x128xf32, #tpu.memory_space<vmem>>, vector<1x8x128xf32>,
    %c11_i32 = arith.constant 11 : i32
    %158 = arith.index_cast %c11_i32 : i32 to index
    %c0_101 = arith.constant 0 : index
    %c0_102 = arith.constant 0 : index
    %159 = vector.load %arg1[%158, %c0_101, %c0_102] : memref<16x8x128xf32, #tpu.memory_space<vmem>>, vector<1x8x128xf32>
    %160 = vector.shape_cast %159 : vector<1x8x128xf32> to vector<8x128xf32>
    %161 = tpu.concatenate %160, %153 in 1 : vector<8x128xf32>, vector<8x128xf32> -> vector<8x256xf32>
    %c0_103 = arith.constant 0 : index
    %c0_104 = arith.constant 0 : index
    %162 = vector.load %arg3[%c0_103, %c0_104] : memref<256x128xf32, #tpu.memory_space<vmem>>, vector<256x128xf32>
    %cst_105 = arith.constant dense<0.000000e+00> : vector<8x128xf32>
    %163 = tpu.matmul %161, %162, %cst_105 {dimension_numbers = #tpu.dot_dimension_numbers<[1], [0], [0], [1], [0, 0, 1, 1], [], []>} : vector<8x256xf32>, vector<256x128xf32>, vector<8x128xf32> -> vector<8x128xf32>
    %c0_106 = arith.constant 0 : index
    %c0_107 = arith.constant 0 : index
    %164 = vector.load %arg4[%c0_106, %c0_107] : memref<1x128xf32, #tpu.memory_space<vmem>>, vector<1x128xf32>
    %165 = vector.broadcast %164 : vector<1x128xf32> to vector<8x128xf32>
    %166 = arith.addf %163, %165 : vector<8x128xf32>
    %167 = math.tanh %166 : vector<8x128xf32>
    %168 = arith.index_cast %c11_i32 : i32 to index
    %c0_108 = arith.constant 0 : index
    %c0_109 = arith.constant 0 : index
    %169 = vector.load %arg5[%168, %c0_108, %c0_109] : memref<16x8x128xf32, #tpu.memory_space<vmem>>, vector<1x8x128xf32>
    %170 = vector.shape_cast %169 : vector<1x8x128xf32> to vector<8x128xf32>
    %171 = vector.shape_cast %167 : vector<8x128xf32> to vector<1x8x128xf32>
    tpu.vector_store %arg5[%168, %c0_108, %c0_109], %171 {strides = array<i32>} : memref<16x8x128xf32, #tpu.memory_space<vmem>>, vector<1x8x128xf32>,
    %c12_i32 = arith.constant 12 : i32
    %172 = arith.index_cast %c12_i32 : i32 to index
    %c0_110 = arith.constant 0 : index
    %c0_111 = arith.constant 0 : index
    %173 = vector.load %arg1[%172, %c0_110, %c0_111] : memref<16x8x128xf32, #tpu.memory_space<vmem>>, vector<1x8x128xf32>
    %174 = vector.shape_cast %173 : vector<1x8x128xf32> to vector<8x128xf32>
    %175 = tpu.concatenate %174, %167 in 1 : vector<8x128xf32>, vector<8x128xf32> -> vector<8x256xf32>
    %c0_112 = arith.constant 0 : index
    %c0_113 = arith.constant 0 : index
    %176 = vector.load %arg3[%c0_112, %c0_113] : memref<256x128xf32, #tpu.memory_space<vmem>>, vector<256x128xf32>
    %cst_114 = arith.constant dense<0.000000e+00> : vector<8x128xf32>
    %177 = tpu.matmul %175, %176, %cst_114 {dimension_numbers = #tpu.dot_dimension_numbers<[1], [0], [0], [1], [0, 0, 1, 1], [], []>} : vector<8x256xf32>, vector<256x128xf32>, vector<8x128xf32> -> vector<8x128xf32>
    %c0_115 = arith.constant 0 : index
    %c0_116 = arith.constant 0 : index
    %178 = vector.load %arg4[%c0_115, %c0_116] : memref<1x128xf32, #tpu.memory_space<vmem>>, vector<1x128xf32>
    %179 = vector.broadcast %178 : vector<1x128xf32> to vector<8x128xf32>
    %180 = arith.addf %177, %179 : vector<8x128xf32>
    %181 = math.tanh %180 : vector<8x128xf32>
    %182 = arith.index_cast %c12_i32 : i32 to index
    %c0_117 = arith.constant 0 : index
    %c0_118 = arith.constant 0 : index
    %183 = vector.load %arg5[%182, %c0_117, %c0_118] : memref<16x8x128xf32, #tpu.memory_space<vmem>>, vector<1x8x128xf32>
    %184 = vector.shape_cast %183 : vector<1x8x128xf32> to vector<8x128xf32>
    %185 = vector.shape_cast %181 : vector<8x128xf32> to vector<1x8x128xf32>
    tpu.vector_store %arg5[%182, %c0_117, %c0_118], %185 {strides = array<i32>} : memref<16x8x128xf32, #tpu.memory_space<vmem>>, vector<1x8x128xf32>,
    %c13_i32 = arith.constant 13 : i32
    %186 = arith.index_cast %c13_i32 : i32 to index
    %c0_119 = arith.constant 0 : index
    %c0_120 = arith.constant 0 : index
    %187 = vector.load %arg1[%186, %c0_119, %c0_120] : memref<16x8x128xf32, #tpu.memory_space<vmem>>, vector<1x8x128xf32>
    %188 = vector.shape_cast %187 : vector<1x8x128xf32> to vector<8x128xf32>
    %189 = tpu.concatenate %188, %181 in 1 : vector<8x128xf32>, vector<8x128xf32> -> vector<8x256xf32>
    %c0_121 = arith.constant 0 : index
    %c0_122 = arith.constant 0 : index
    %190 = vector.load %arg3[%c0_121, %c0_122] : memref<256x128xf32, #tpu.memory_space<vmem>>, vector<256x128xf32>
    %cst_123 = arith.constant dense<0.000000e+00> : vector<8x128xf32>
    %191 = tpu.matmul %189, %190, %cst_123 {dimension_numbers = #tpu.dot_dimension_numbers<[1], [0], [0], [1], [0, 0, 1, 1], [], []>} : vector<8x256xf32>, vector<256x128xf32>, vector<8x128xf32> -> vector<8x128xf32>
    %c0_124 = arith.constant 0 : index
    %c0_125 = arith.constant 0 : index
    %192 = vector.load %arg4[%c0_124, %c0_125] : memref<1x128xf32, #tpu.memory_space<vmem>>, vector<1x128xf32>
    %193 = vector.broadcast %192 : vector<1x128xf32> to vector<8x128xf32>
    %194 = arith.addf %191, %193 : vector<8x128xf32>
    %195 = math.tanh %194 : vector<8x128xf32>
    %196 = arith.index_cast %c13_i32 : i32 to index
    %c0_126 = arith.constant 0 : index
    %c0_127 = arith.constant 0 : index
    %197 = vector.load %arg5[%196, %c0_126, %c0_127] : memref<16x8x128xf32, #tpu.memory_space<vmem>>, vector<1x8x128xf32>
    %198 = vector.shape_cast %197 : vector<1x8x128xf32> to vector<8x128xf32>
    %199 = vector.shape_cast %195 : vector<8x128xf32> to vector<1x8x128xf32>
    tpu.vector_store %arg5[%196, %c0_126, %c0_127], %199 {strides = array<i32>} : memref<16x8x128xf32, #tpu.memory_space<vmem>>, vector<1x8x128xf32>,
    %c14_i32 = arith.constant 14 : i32
    %200 = arith.index_cast %c14_i32 : i32 to index
    %c0_128 = arith.constant 0 : index
    %c0_129 = arith.constant 0 : index
    %201 = vector.load %arg1[%200, %c0_128, %c0_129] : memref<16x8x128xf32, #tpu.memory_space<vmem>>, vector<1x8x128xf32>
    %202 = vector.shape_cast %201 : vector<1x8x128xf32> to vector<8x128xf32>
    %203 = tpu.concatenate %202, %195 in 1 : vector<8x128xf32>, vector<8x128xf32> -> vector<8x256xf32>
    %c0_130 = arith.constant 0 : index
    %c0_131 = arith.constant 0 : index
    %204 = vector.load %arg3[%c0_130, %c0_131] : memref<256x128xf32, #tpu.memory_space<vmem>>, vector<256x128xf32>
    %cst_132 = arith.constant dense<0.000000e+00> : vector<8x128xf32>
    %205 = tpu.matmul %203, %204, %cst_132 {dimension_numbers = #tpu.dot_dimension_numbers<[1], [0], [0], [1], [0, 0, 1, 1], [], []>} : vector<8x256xf32>, vector<256x128xf32>, vector<8x128xf32> -> vector<8x128xf32>
    %c0_133 = arith.constant 0 : index
    %c0_134 = arith.constant 0 : index
    %206 = vector.load %arg4[%c0_133, %c0_134] : memref<1x128xf32, #tpu.memory_space<vmem>>, vector<1x128xf32>
    %207 = vector.broadcast %206 : vector<1x128xf32> to vector<8x128xf32>
    %208 = arith.addf %205, %207 : vector<8x128xf32>
    %209 = math.tanh %208 : vector<8x128xf32>
    %210 = arith.index_cast %c14_i32 : i32 to index
    %c0_135 = arith.constant 0 : index
    %c0_136 = arith.constant 0 : index
    %211 = vector.load %arg5[%210, %c0_135, %c0_136] : memref<16x8x128xf32, #tpu.memory_space<vmem>>, vector<1x8x128xf32>
    %212 = vector.shape_cast %211 : vector<1x8x128xf32> to vector<8x128xf32>
    %213 = vector.shape_cast %209 : vector<8x128xf32> to vector<1x8x128xf32>
    tpu.vector_store %arg5[%210, %c0_135, %c0_136], %213 {strides = array<i32>} : memref<16x8x128xf32, #tpu.memory_space<vmem>>, vector<1x8x128xf32>,
    %c15_i32 = arith.constant 15 : i32
    %214 = arith.index_cast %c15_i32 : i32 to index
    %c0_137 = arith.constant 0 : index
    %c0_138 = arith.constant 0 : index
    %215 = vector.load %arg1[%214, %c0_137, %c0_138] : memref<16x8x128xf32, #tpu.memory_space<vmem>>, vector<1x8x128xf32>
    %216 = vector.shape_cast %215 : vector<1x8x128xf32> to vector<8x128xf32>
    %217 = tpu.concatenate %216, %209 in 1 : vector<8x128xf32>, vector<8x128xf32> -> vector<8x256xf32>
    %c0_139 = arith.constant 0 : index
    %c0_140 = arith.constant 0 : index
    %218 = vector.load %arg3[%c0_139, %c0_140] : memref<256x128xf32, #tpu.memory_space<vmem>>, vector<256x128xf32>
    %cst_141 = arith.constant dense<0.000000e+00> : vector<8x128xf32>
    %219 = tpu.matmul %217, %218, %cst_141 {dimension_numbers = #tpu.dot_dimension_numbers<[1], [0], [0], [1], [0, 0, 1, 1], [], []>} : vector<8x256xf32>, vector<256x128xf32>, vector<8x128xf32> -> vector<8x128xf32>
    %c0_142 = arith.constant 0 : index
    %c0_143 = arith.constant 0 : index
    %220 = vector.load %arg4[%c0_142, %c0_143] : memref<1x128xf32, #tpu.memory_space<vmem>>, vector<1x128xf32>
    %221 = vector.broadcast %220 : vector<1x128xf32> to vector<8x128xf32>
    %222 = arith.addf %219, %221 : vector<8x128xf32>
    %223 = math.tanh %222 : vector<8x128xf32>
    %224 = arith.index_cast %c15_i32 : i32 to index
    %c0_144 = arith.constant 0 : index
    %c0_145 = arith.constant 0 : index
    %225 = vector.load %arg5[%224, %c0_144, %c0_145] : memref<16x8x128xf32, #tpu.memory_space<vmem>>, vector<1x8x128xf32>
    %226 = vector.shape_cast %225 : vector<1x8x128xf32> to vector<8x128xf32>
    %227 = vector.shape_cast %223 : vector<8x128xf32> to vector<1x8x128xf32>
    tpu.vector_store %arg5[%224, %c0_144, %c0_145], %227 {strides = array<i32>} : memref<16x8x128xf32, #tpu.memory_space<vmem>>, vector<1x8x128xf32>,
    %c16_i32 = arith.constant 16 : i32
    %c0_146 = arith.constant 0 : index
    %c0_147 = arith.constant 0 : index
    %228 = vector.load %arg7[%c0_146, %c0_147] : memref<8x128xf32, #tpu.memory_space<vmem>>, vector<8x128xf32>
    tpu.vector_store %arg7[%c0_146, %c0_147], %223 {strides = array<i32>} : memref<8x128xf32, #tpu.memory_space<vmem>>, vector<8x128xf32>,
    %c0_i32_148 = arith.constant 0 : i32
    %229 = arith.cmpi eq, %arg0, %c0_i32_148 : i32
    %230 = arith.extui %229 : i1 to i32
    %c0_i32_149 = arith.constant 0 : i32
    %231 = arith.cmpi ne, %230, %c0_i32_149 : i32
    scf.if %231 {
      %c0_150 = arith.constant 0 : index
      %c0_151 = arith.constant 0 : index
      %232 = vector.load %arg6[%c0_150, %c0_151] : memref<8x128xf32, #tpu.memory_space<vmem>>, vector<8x128xf32>
      tpu.vector_store %arg6[%c0_150, %c0_151], %223 {strides = array<i32>} : memref<8x128xf32, #tpu.memory_space<vmem>>, vector<8x128xf32>,
    } else {
    }
    return
  }
  func.func @transform_0(%arg0: i32) -> (i32, i32, i32) {
    %c0_i32 = arith.constant 0 : i32
    %c0_i32_0 = arith.constant 0 : i32
    %c0_i32_1 = arith.constant 0 : i32
    return %arg0, %c0_i32, %c0_i32_0 : i32, i32, i32
  }
  func.func @transform_1(%arg0: i32) -> (i32, i32) {
    %c0_i32 = arith.constant 0 : i32
    %c0_i32_0 = arith.constant 0 : i32
    %c0_i32_1 = arith.constant 0 : i32
    return %c0_i32, %c0_i32_0 : i32, i32
  }
  func.func @transform_2(%arg0: i32) -> (i32, i32) {
    %c0_i32 = arith.constant 0 : i32
    %c0_i32_0 = arith.constant 0 : i32
    %c0_i32_1 = arith.constant 0 : i32
    return %c0_i32, %c0_i32_0 : i32, i32
  }
  func.func @transform_3(%arg0: i32) -> (i32, i32) {
    %c0_i32 = arith.constant 0 : i32
    %c0_i32_0 = arith.constant 0 : i32
    %c0_i32_1 = arith.constant 0 : i32
    return %c0_i32, %c0_i32_0 : i32, i32
  }
  func.func @transform_4(%arg0: i32) -> (i32, i32, i32) {
    %c0_i32 = arith.constant 0 : i32
    %c0_i32_0 = arith.constant 0 : i32
    %c0_i32_1 = arith.constant 0 : i32
    return %arg0, %c0_i32, %c0_i32_0 : i32, i32, i32
  }
  func.func @transform_5(%arg0: i32) -> (i32, i32) {
    %c0_i32 = arith.constant 0 : i32
    %c0_i32_0 = arith.constant 0 : i32
    %c0_i32_1 = arith.constant 0 : i32
    return %c0_i32, %c0_i32_0 : i32, i32
  }
}

</mosaic_0001>

<bundles_post_ra>
// kernel: rnn_lm_forward.3
= control target key start
LH: loop header
LB: loop body
LE: loop exit
PB: predicated region body
PF: predicated region fallthrough
CT: control target
= control target key end

     0   :  { %s669_s0 = inlined_call_operand.vmem [shape: f32[128,128], index: 0, kind: input, shape index: {}]   ;;  %s670_s1 = inlined_call_operand.vmem [shape: f32[128,128], index: 1, kind: input, shape index: {}]   ;;  %s671_s2 = inlined_call_operand.vmem [shape: f32[1,128], index: 2, kind: input, shape index: {}]   ;;  %s672_s3 = inlined_call_operand.hbm [shape: f32[128,128], index: 3, kind: output, shape index: {}]  }
   0x1   :  { %v46_v0 = vld [vmem:[%s670_s1 + $0x78] sm:$0xff]  ;;  %v45_v1 = vld [vmem:[%s670_s1 + $0x70] sm:$0xff]  ;;  %v44_v2 = vld [vmem:[%s670_s1 + $0x68] sm:$0xff] }
   0x2   :  { %51 = vmatpush.msra.mxu0 %v46_v0  ;;  %310 = vmatpush.msra.mxu1 %v46_v0  ;;  %v43_v3 = vld [vmem:[%s670_s1 + $0x60] sm:$0xff]  ;;  %v42_v4 = vld [vmem:[%s670_s1 + $0x58] sm:$0xff] }
   0x3   :  { %311 = vmatpush.msra.mxu2 %v46_v0  ;;  %312 = vmatpush.msra.mxu3 %v46_v0 }
   0x4   :  { %52 = vmatpush.msra.mxu0 %v45_v1  ;;  %313 = vmatpush.msra.mxu1 %v45_v1 }
   0x5   :  { %314 = vmatpush.msra.mxu2 %v45_v1  ;;  %315 = vmatpush.msra.mxu3 %v45_v1 }
   0x6   :  { %53 = vmatpush.msra.mxu0 %v44_v2  ;;  %316 = vmatpush.msra.mxu1 %v44_v2 }
   0x7   :  { %317 = vmatpush.msra.mxu2 %v44_v2  ;;  %318 = vmatpush.msra.mxu3 %v44_v2 }
   0x8   :  { %54 = vmatpush.msra.mxu0 %v43_v3  ;;  %319 = vmatpush.msra.mxu1 %v43_v3 }
   0x9   :  { %8 = vsyncpa [#allocation3], 0  ;;  %320 = vmatpush.msra.mxu2 %v43_v3  ;;  %321 = vmatpush.msra.mxu3 %v43_v3  ;;  %v41_v5 = vld [vmem:[%s670_s1 + $0x50] sm:$0xff]  ;;  %v40_v6 = vld [vmem:[%s670_s1 + $0x48] sm:$0xff]  ;;  %s298_s24 = sshll.u32 %s672_s3, 4  ;;  %s453_s25 = smov 128   ;;  %s299_s24 = int_to_ptr.hbm [resolvable:$true] %s298_s24 }
   0xa   :  { %55 = vmatpush.msra.mxu0 %v42_v4  ;;  %322 = vmatpush.msra.mxu1 %v42_v4  ;;  %v39_v7 = vld [vmem:[%s670_s1 + $0x40] sm:$0xff]  ;;  %v38_v8 = vld [vmem:[%s670_s1 + $0x38] sm:$0xff]  ;;  %v37_v9 = vld [vmem:[%s670_s1 + $0x30] sm:$0xff]  ;;  %s454_s26 = smov 8  }
   0xb   :  { %323 = vmatpush.msra.mxu2 %v42_v4  ;;  %324 = vmatpush.msra.mxu3 %v42_v4  ;;  %v36_v10 = vld [vmem:[%s670_s1 + $0x28] sm:$0xff]  ;;  %v35_v11 = vld [vmem:[%s670_s1 + $0x20] sm:$0xff]  ;;  %v34_v12 = vld [vmem:[%s670_s1 + $0x18] sm:$0xff] }
   0xc   :  { %56 = vmatpush.msra.mxu0 %v41_v5  ;;  %325 = vmatpush.msra.mxu1 %v41_v5  ;;  %v33_v13 = vld [vmem:[%s670_s1 + $0x10] sm:$0xff]  ;;  %v32_v14 = vld [vmem:[%s670_s1 + $0x8] sm:$0xff]  ;;  %v31_v15 = vld [vmem:[%s670_s1] sm:$0xff] }
   0xd   :  { %326 = vmatpush.msra.mxu2 %v41_v5  ;;  %327 = vmatpush.msra.mxu3 %v41_v5  ;;  %v15_v16 = vld [vmem:[%s669_s0] sm:$0xff]  ;;  %v16_v20 = vld [vmem:[%s669_s0 + $0x8] sm:$0xff]  ;;  %v17_v24 = vld [vmem:[%s669_s0 + $0x10] sm:$0xff] }
   0xe   :  { %57 = vmatpush.msra.mxu0 %v40_v6  ;;  %328 = vmatpush.msra.mxu1 %v40_v6  ;;  %v19_v17 = vld [vmem:[%s669_s0 + $0x20] sm:$0xff]  ;;  %v24_v21 = vld [vmem:[%s669_s0 + $0x48] sm:$0xff]  ;;  %v25_v25 = vld [vmem:[%s669_s0 + $0x50] sm:$0xff] }
   0xf   :  { %329 = vmatpush.msra.mxu2 %v40_v6  ;;  %330 = vmatpush.msra.mxu3 %v40_v6  ;;  %v23_v18 = vld [vmem:[%s669_s0 + $0x40] sm:$0xff]  ;;  %v20_v22 = vld [vmem:[%s669_s0 + $0x28] sm:$0xff]  ;;  %v21_v26 = vld [vmem:[%s669_s0 + $0x30] sm:$0xff] }
  0x10   :  { %58 = vmatpush.msra.mxu0 %v39_v7  ;;  %331 = vmatpush.msra.mxu1 %v39_v7  ;;  %v27_v19 = vld [vmem:[%s669_s0 + $0x60] sm:$0xff]  ;;  %v28_v23 = vld [vmem:[%s669_s0 + $0x68] sm:$0xff]  ;;  %v29_v27 = vld [vmem:[%s669_s0 + $0x70] sm:$0xff] }
  0x11   :  { %332 = vmatpush.msra.mxu2 %v39_v7  ;;  %333 = vmatpush.msra.mxu3 %v39_v7  ;;  %v18_v28 = vld [vmem:[%s669_s0 + $0x18] sm:$0xff]  ;;  %v361_v32 = vld [vmem:[%s671_s2] ss:$0 sm:$0xff] }
  0x12   :  { %59 = vmatpush.msra.mxu0 %v38_v8  ;;  %334 = vmatpush.msra.mxu1 %v38_v8  ;;  %v26_v29 = vld [vmem:[%s669_s0 + $0x58] sm:$0xff] }
  0x13   :  { %335 = vmatpush.msra.mxu2 %v38_v8  ;;  %336 = vmatpush.msra.mxu3 %v38_v8  ;;  %v22_v30 = vld [vmem:[%s669_s0 + $0x38] sm:$0xff] }
  0x14   :  { %60 = vmatpush.msra.mxu0 %v37_v9  ;;  %337 = vmatpush.msra.mxu1 %v37_v9  ;;  %v30_v31 = vld [vmem:[%s669_s0 + $0x78] sm:$0xff]  ;;  %s452_s0 = smov [#allocation2]  }
  0x15   :  { %338 = vmatpush.msra.mxu2 %v37_v9  ;;  %339 = vmatpush.msra.mxu3 %v37_v9  ;;  %s296_s2 = sshll.u32 %s452_s0, 4  ;;  %s297_s2 = int_to_ptr.vmem [resolvable:$true] %s296_s2 }
  0x16   :  { %61 = vmatpush.msra.mxu0 %v36_v10  ;;  %340 = vmatpush.msra.mxu1 %v36_v10 }
  0x17   :  { %341 = vmatpush.msra.mxu2 %v36_v10  ;;  %342 = vmatpush.msra.mxu3 %v36_v10 }
  0x18   :  { %62 = vmatpush.msra.mxu0 %v35_v11  ;;  %343 = vmatpush.msra.mxu1 %v35_v11 }
  0x19   :  { %344 = vmatpush.msra.mxu2 %v35_v11  ;;  %345 = vmatpush.msra.mxu3 %v35_v11 }
  0x1a   :  { %63 = vmatpush.msra.mxu0 %v34_v12  ;;  %346 = vmatpush.msra.mxu1 %v34_v12 }
  0x1b   :  { %347 = vmatpush.msra.mxu2 %v34_v12  ;;  %348 = vmatpush.msra.mxu3 %v34_v12 }
  0x1c   :  { %64 = vmatpush.msra.mxu0 %v33_v13  ;;  %349 = vmatpush.msra.mxu1 %v33_v13 }
  0x1d   :  { %350 = vmatpush.msra.mxu2 %v33_v13  ;;  %351 = vmatpush.msra.mxu3 %v33_v13 }
  0x1e   :  { %65 = vmatpush.msra.mxu0 %v32_v14  ;;  %352 = vmatpush.msra.mxu1 %v32_v14 }
  0x1f   :  { %353 = vmatpush.msra.mxu2 %v32_v14  ;;  %354 = vmatpush.msra.mxu3 %v32_v14 }
  0x20   :  { %66 = vmatpush.msra.mxu0 %v31_v15  ;;  %355 = vmatpush.msra.mxu1 %v31_v15 }
  0x21   :  { %356 = vmatpush.msra.mxu2 %v31_v15  ;;  %67 = vmatmul.f32.vlgmr.msra.gmra.mxu0 %v15_v16 }
  0x22   :  { %79 = vmatmul.f32.vlgmr.msra.gmra.mxu1 %v19_v17  ;;  %91 = vmatmul.f32.vlgmr.msra.gmra.mxu2 %v23_v18 }
  0x23   :  { %357 = vmatpush.msra.mxu3 %v31_v15 }
  0x24   :  { %103 = vmatmul.f32.vlgmr.msra.gmra.mxu3 %v27_v19 }
  0x29   :  { %70 = vmatmul.f32.gmra.mxu0 %v16_v20 }
  0x2a   :  { %94 = vmatmul.f32.gmra.mxu2 %v24_v21  ;;  %82 = vmatmul.f32.gmra.mxu1 %v20_v22 }
  0x2c   :  { %106 = vmatmul.f32.gmra.mxu3 %v28_v23 }
  0x31   :  { %73 = vmatmul.f32.gmra.mxu0 %v17_v24 }
  0x32   :  { %97 = vmatmul.f32.gmra.mxu2 %v25_v25  ;;  %85 = vmatmul.f32.gmra.mxu1 %v21_v26 }
  0x34   :  { %109 = vmatmul.f32.gmra.mxu3 %v29_v27 }
  0x39   :  { %76 = vmatmul.f32.gmra.mxu0 %v18_v28 }
  0x3a   :  { %100 = vmatmul.f32.gmra.mxu2 %v26_v29  ;;  %88 = vmatmul.f32.gmra.mxu1 %v22_v30 }
  0x3c   :  { %112 = vmatmul.f32.gmra.mxu3 %v30_v31 }
  0x9e   :  { %v68_v33 = vpop.f32.mrf.mxu0 }
  0x9f   :  { %v69_v34 = vadd.f32 %v361_v32, %v68_v33  ;;  %v80_v35 = vpop.f32.mrf.mxu1 }
  0xa0   :  { %v81_v36 = vadd.f32 %v361_v32, %v80_v35 }
  0xa1   :  { %116 = vmax.xlane.f32.xlu0 %v69_v34 }
  0xa2   :  { %124 = vmax.xlane.f32.xlu2 %v81_v36 }
  0xa5   :  { %v92_v37 = vpop.f32.mrf.mxu2 }
  0xa6   :  { %v93_v38 = vadd.f32 %v361_v32, %v92_v37  ;;  %v71_v39 = vpop.f32.mrf.mxu0 }
  0xa7   :  { %v104_v40 = vpop.f32.mrf.mxu3  ;;  %v83_v42 = vpop.f32.mrf.mxu1  ;;  %v72_v48 = vadd.f32 %v361_v32, %v71_v39 }
  0xa8   :  { %v105_v41 = vadd.f32 %v361_v32, %v104_v40  ;;  %v84_v45 = vadd.f32 %v361_v32, %v83_v42 }
  0xaa   :  { %132 = vmax.xlane.f32.xlu2 %v93_v38  ;;  %140 = vmax.xlane.f32.xlu0 %v105_v41 }
  0xad   :  { %v95_v43 = vpop.f32.mrf.mxu2 }
  0xae   :  { %v74_v44 = vpop.f32.mrf.mxu0  ;;  %v96_v51 = vadd.f32 %v361_v32, %v95_v43 }
  0xaf   :  { %v75_v46 = vadd.f32 %v361_v32, %v74_v44  ;;  %v107_v47 = vpop.f32.mrf.mxu3  ;;  %v86_v52 = vpop.f32.mrf.mxu1 }
  0xb0   :  { %v578_v58 = vadd.f32 %v361_v32, %v86_v52  ;;  %v592_v0 = vadd.f32 %v361_v32, %v107_v47 }
  0xb1   :  { %120 = vmax.xlane.f32.xlu1 %v75_v46 }
  0xb2   :  { %126 = vmax.xlane.f32.xlu2 %v84_v45  ;;  %118 = vmax.xlane.f32.xlu0 %v72_v48 }
  0xb5   :  { %v98_v49 = vpop.f32.mrf.mxu2 }
  0xb6   :  { %v99_v50 = vadd.f32 %v361_v32, %v98_v49  ;;  %v77_v54 = vpop.f32.mrf.mxu0 }
  0xb7   :  { %v110_v53 = vpop.f32.mrf.mxu3  ;;  %v574_v56 = vadd.f32 %v361_v32, %v77_v54  ;;  %v89_v59 = vpop.f32.mrf.mxu1 }
  0xb8   :  { %v583_v61 = vadd.f32 %v361_v32, %v110_v53  ;;  %v585_v62 = vadd.f32 %v361_v32, %v89_v59 }
  0xb9   :  { %136 = vmax.xlane.f32.xlu1 %v99_v50 }
  0xba   :  { %134 = vmax.xlane.f32.xlu0 %v96_v51 }
  0xbd   :  { %v101_v55 = vpop.f32.mrf.mxu2 }
  0xbe   :  { %v576_v57 = vadd.f32 %v361_v32, %v101_v55 }
  0xbf   :  { %v113_v60 = vpop.f32.mrf.mxu3 }
  0xc0   :  { %138 = vmax.xlane.f32.xlu2 %v576_v57  ;;  %v587_v63 = vadd.f32 %v361_v32, %v113_v60 }
  0xc1   :  { %122 = vmax.xlane.f32.xlu1 %v574_v56 }
  0xc2   :  { %128 = vmax.xlane.f32.xlu0 %v578_v58 }
  0xc8   :  { %144 = vmax.xlane.f32.xlu2 %v583_v61 }
  0xc9   :  { %130 = vmax.xlane.f32.xlu1 %v585_v62 }
  0xca   :  { %146 = vmax.xlane.f32.xlu0 %v587_v63 }
  0xd1   :  { %142 = vmax.xlane.f32.xlu1 %v592_v0 }
 0x114   :  { %v117_v1 = vpop.xlane.xlu0 %116 }
 0x115   :  { %v125_v2 = vpop.xlane.xlu2 %124  ;;  %v595_v3 = vsub.f32 %v69_v34, %v117_v1 }
 0x116   :  { %v597_v4 = vsub.f32 %v81_v36, %v125_v2 }
 0x117   :  { %v164_v5 = vmul.f32 1.442695, %v595_v3 }
 0x118   :  { %v172_v6 = vmul.f32 1.442695, %v597_v4 }
 0x119   :  { %362 = vpow2.f32 %v164_v5 }
 0x11a   :  { %364 = vpow2.f32 %v172_v6 }
 0x11d   :  { %v133_v7 = vpop.xlane.xlu2 %132  ;;  %v141_v8 = vpop.xlane.xlu0 %140 }
 0x11e   :  { %v601_v9 = vsub.f32 %v93_v38, %v133_v7  ;;  %v603_v10 = vsub.f32 %v105_v41, %v141_v8 }
 0x11f   :  { %v363_v11 = vpop.eup %362 }
 0x120   :  { %v365_v12 = vpop.eup %364  ;;  %v180_v13 = vmul.f32 1.442695, %v601_v9  ;;  %v188_v14 = vmul.f32 1.442695, %v603_v10  ;;  %196 = vadd.xlane.f32.xlu1 %v363_v11 }
 0x121   :  { %204 = vadd.xlane.f32.xlu2 %v365_v12 }
 0x122   :  { %366 = vpow2.f32 %v180_v13 }
 0x123   :  { %368 = vpow2.f32 %v188_v14 }
 0x124   :  { %v121_v15 = vpop.xlane.xlu1 %120 }
 0x125   :  { %v127_v16 = vpop.xlane.xlu2 %126  ;;  %v119_v17 = vpop.xlane.xlu0 %118  ;;  %v612_v22 = vsub.f32 %v75_v46, %v121_v15 }
 0x126   :  { %v607_v18 = vsub.f32 %v84_v45, %v127_v16  ;;  %v609_v19 = vsub.f32 %v72_v48, %v119_v17 }
 0x127   :  { %v168_v25 = vmul.f32 1.442695, %v612_v22 }
 0x128   :  { %v367_v20 = vpop.eup %366  ;;  %v174_v21 = vmul.f32 1.442695, %v607_v18  ;;  %v166_v23 = vmul.f32 1.442695, %v609_v19 }
 0x129   :  { %v369_v24 = vpop.eup %368  ;;  %212 = vadd.xlane.f32.xlu0 %v367_v20 }
 0x12a   :  { %370 = vpow2.f32 %v174_v21  ;;  %220 = vadd.xlane.f32.xlu1 %v369_v24 }
 0x12b   :  { %372 = vpow2.f32 %v166_v23 }
 0x12c   :  { %v137_v26 = vpop.xlane.xlu1 %136  ;;  %374 = vpow2.f32 %v168_v25 }
 0x12d   :  { %v616_v27 = vsub.f32 %v99_v50, %v137_v26  ;;  %v135_v28 = vpop.xlane.xlu0 %134 }
 0x12e   :  { %v618_v29 = vsub.f32 %v96_v51, %v135_v28 }
 0x12f   :  { %v184_v30 = vmul.f32 1.442695, %v616_v27 }
 0x130   :  { %v371_v31 = vpop.eup %370  ;;  %v182_v32 = vmul.f32 1.442695, %v618_v29 }
 0x131   :  { %v373_v33 = vpop.eup %372  ;;  %376 = vpow2.f32 %v184_v30  ;;  %206 = vadd.xlane.f32.xlu0 %v371_v31 }
 0x132   :  { %378 = vpow2.f32 %v182_v32  ;;  %198 = vadd.xlane.f32.xlu2 %v373_v33  ;;  %v375_v38 = vpop.eup %374 }
 0x133   :  { %v139_v34 = vpop.xlane.xlu2 %138 }
 0x134   :  { %v623_v35 = vsub.f32 %v576_v57, %v139_v34  ;;  %v123_v36 = vpop.xlane.xlu1 %122 }
 0x135   :  { %v129_v37 = vpop.xlane.xlu0 %128  ;;  %v630_v43 = vsub.f32 %v574_v56, %v123_v36 }
 0x136   :  { %v186_v39 = vmul.f32 1.442695, %v623_v35  ;;  %v627_v40 = vsub.f32 %v578_v58, %v129_v37 }
 0x137   :  { %v377_v41 = vpop.eup %376  ;;  %v170_v46 = vmul.f32 1.442695, %v630_v43 }
 0x138   :  { %v379_v42 = vpop.eup %378  ;;  %v176_v44 = vmul.f32 1.442695, %v627_v40  ;;  %380 = vpow2.f32 %v186_v39 }
 0x139   :  { %200 = vadd.xlane.f32.xlu0 %v375_v38  ;;  %214 = vadd.xlane.f32.xlu1 %v379_v42 }
 0x13a   :  { %382 = vpow2.f32 %v176_v44  ;;  %216 = vadd.xlane.f32.xlu2 %v377_v41 }
 0x13b   :  { %v145_v45 = vpop.xlane.xlu2 %144  ;;  %384 = vpow2.f32 %v170_v46 }
 0x13c   :  { %v635_v47 = vsub.f32 %v583_v61, %v145_v45  ;;  %v131_v48 = vpop.xlane.xlu1 %130 }
 0x13d   :  { %v638_v49 = vsub.f32 %v585_v62, %v131_v48  ;;  %v147_v53 = vpop.xlane.xlu0 %146 }
 0x13e   :  { %v192_v50 = vmul.f32 1.442695, %v635_v47  ;;  %v381_v51 = vpop.eup %380  ;;  %v643_v55 = vsub.f32 %v587_v63, %v147_v53 }
 0x13f   :  { %v178_v52 = vmul.f32 1.442695, %v638_v49 }
 0x140   :  { %v383_v54 = vpop.eup %382  ;;  %v194_v59 = vmul.f32 1.442695, %v643_v55 }
 0x141   :  { %386 = vpow2.f32 %v178_v52  ;;  %218 = vadd.xlane.f32.xlu0 %v381_v51  ;;  %208 = vadd.xlane.f32.xlu1 %v383_v54  ;;  %v385_v58 = vpop.eup %384 }
 0x142   :  { %388 = vpow2.f32 %v192_v50 }
 0x144   :  { %v143_v56 = vpop.xlane.xlu1 %142 }
 0x145   :  { %v646_v57 = vsub.f32 %v592_v0, %v143_v56 }
 0x147   :  { %v387_v60 = vpop.eup %386  ;;  %v190_v61 = vmul.f32 1.442695, %v646_v57 }
 0x148   :  { %v389_v62 = vpop.eup %388  ;;  %210 = vadd.xlane.f32.xlu2 %v387_v60 }
 0x149   :  { %390 = vpow2.f32 %v190_v61  ;;  %224 = vadd.xlane.f32.xlu0 %v389_v62  ;;  %202 = vadd.xlane.f32.xlu1 %v385_v58 }
 0x14a   :  { %392 = vpow2.f32 %v194_v59 }
 0x14f   :  { %v391_v1 = vpop.eup %390 }
 0x150   :  { %v393_v2 = vpop.eup %392  ;;  %222 = vadd.xlane.f32.xlu2 %v391_v1 }
 0x151   :  { %226 = vadd.xlane.f32.xlu1 %v393_v2 }
 0x193   :  { %v197_v63 = vpop.xlane.xlu1 %196 }
 0x194   :  { %v205_v5 = vpop.xlane.xlu2 %204  ;;  %394 = vlog2.f32 %v197_v63 }
 0x195   :  { %396 = vlog2.f32 %v205_v5 }
 0x19a   :  { %v395_v0 = vpop.eup %394 }
 0x19b   :  { %v397_v6 = vpop.eup %396  ;;  %v229_v7 = vmul.f32 0.6931472, %v395_v0 }
 0x19c   :  { %v237_v8 = vmul.f32 0.6931472, %v397_v6  ;;  %v213_v11 = vpop.xlane.xlu0 %212 }
 0x19d   :  { %v260_v12 = vsub.f32 %v595_v3, %v229_v7  ;;  %v221_v13 = vpop.xlane.xlu1 %220  ;;  %398 = vlog2.f32 %v213_v11 }
 0x19e   :  { %v264_v14 = vsub.f32 %v597_v4, %v237_v8  ;;  %400 = vlog2.f32 %v221_v13 }
 0x19f   :  { %276 = vst [vmem:[#allocation2] sm:$0xff] %v260_v12 }
 0x1a0   :  { %280 = vst [vmem:[#allocation2 + $0x20] sm:$0xff] %v264_v14 }
 0x1a3   :  { %v399_v15 = vpop.eup %398 }
 0x1a4   :  { %v401_v16 = vpop.eup %400  ;;  %v245_v17 = vmul.f32 0.6931472, %v399_v15  ;;  %v207_v20 = vpop.xlane.xlu0 %206 }
 0x1a5   :  { %v253_v21 = vmul.f32 0.6931472, %v401_v16  ;;  %v199_v23 = vpop.xlane.xlu2 %198  ;;  %402 = vlog2.f32 %v207_v20 }
 0x1a6   :  { %v268_v24 = vsub.f32 %v601_v9, %v245_v17  ;;  %404 = vlog2.f32 %v199_v23 }
 0x1a7   :  { %v272_v25 = vsub.f32 %v603_v10, %v253_v21 }
 0x1a8   :  { %284 = vst [vmem:[#allocation2 + $0x40] sm:$0xff] %v268_v24 }
 0x1a9   :  { %288 = vst [vmem:[#allocation2 + $0x60] sm:$0xff] %v272_v25 }
 0x1ab   :  { %v403_v3 = vpop.eup %402 }
 0x1ac   :  { %v405_v26 = vpop.eup %404  ;;  %v239_v4 = vmul.f32 0.6931472, %v403_v3  ;;  %v215_v28 = vpop.xlane.xlu1 %214 }
 0x1ad   :  { %v201_v30 = vpop.xlane.xlu0 %200  ;;  %v231_v31 = vmul.f32 0.6931472, %v405_v26  ;;  %v217_v32 = vpop.xlane.xlu2 %216  ;;  %406 = vlog2.f32 %v215_v28 }
 0x1ae   :  { %v265_v33 = vsub.f32 %v607_v18, %v239_v4  ;;  %408 = vlog2.f32 %v217_v32 }
 0x1af   :  { %v261_v34 = vsub.f32 %v609_v19, %v231_v31  ;;  %410 = vlog2.f32 %v201_v30 }
 0x1b0   :  { %281 = vst [vmem:[#allocation2 + $0x28] sm:$0xff] %v265_v33 }
 0x1b1   :  { %277 = vst [vmem:[#allocation2 + $0x8] sm:$0xff] %v261_v34 }
 0x1b3   :  { %v407_v9 = vpop.eup %406 }
 0x1b4   :  { %v409_v10 = vpop.eup %408  ;;  %v247_v36 = vmul.f32 0.6931472, %v407_v9  ;;  %v209_v37 = vpop.xlane.xlu1 %208 }
 0x1b5   :  { %v219_v38 = vpop.xlane.xlu0 %218  ;;  %v411_v39 = vpop.eup %410  ;;  %v249_v41 = vmul.f32 0.6931472, %v409_v10  ;;  %412 = vlog2.f32 %v209_v37 }
 0x1b6   :  { %v269_v42 = vsub.f32 %v618_v29, %v247_v36  ;;  %v233_v44 = vmul.f32 0.6931472, %v411_v39  ;;  %414 = vlog2.f32 %v219_v38 }
 0x1b7   :  { %v270_v18 = vsub.f32 %v616_v27, %v249_v41 }
 0x1b8   :  { %285 = vst [vmem:[#allocation2 + $0x48] sm:$0xff] %v269_v42  ;;  %v262_v19 = vsub.f32 %v612_v22, %v233_v44 }
 0x1b9   :  { %286 = vst [vmem:[#allocation2 + $0x50] sm:$0xff] %v270_v18 }
 0x1ba   :  { %278 = vst [vmem:[#allocation2 + $0x10] sm:$0xff] %v262_v19 }
 0x1bb   :  { %v413_v45 = vpop.eup %412  ;;  %v211_v46 = vpop.xlane.xlu2 %210 }
 0x1bc   :  { %v415_v48 = vpop.eup %414  ;;  %v241_v50 = vmul.f32 0.6931472, %v413_v45  ;;  %416 = vlog2.f32 %v211_v46  ;;  %v203_v51 = vpop.xlane.xlu1 %202 }
 0x1bd   :  { %v225_v52 = vpop.xlane.xlu0 %224  ;;  %v251_v53 = vmul.f32 0.6931472, %v415_v48  ;;  %418 = vlog2.f32 %v203_v51 }
 0x1be   :  { %v266_v29 = vsub.f32 %v627_v40, %v241_v50  ;;  %420 = vlog2.f32 %v225_v52 }
 0x1bf   :  { %v271_v54 = vsub.f32 %v623_v35, %v251_v53 }
 0x1c0   :  { %282 = vst [vmem:[#allocation2 + $0x30] sm:$0xff] %v266_v29 }
 0x1c1   :  { %287 = vst [vmem:[#allocation2 + $0x58] sm:$0xff] %v271_v54 }
 0x1c2   :  { %v417_v27 = vpop.eup %416 }
 0x1c3   :  { %v419_v22 = vpop.eup %418  ;;  %v243_v56 = vmul.f32 0.6931472, %v417_v27  ;;  %v223_v58 = vpop.xlane.xlu2 %222 }
 0x1c4   :  { %v421_v59 = vpop.eup %420  ;;  %v235_v60 = vmul.f32 0.6931472, %v419_v22  ;;  %422 = vlog2.f32 %v223_v58  ;;  %v227_v61 = vpop.xlane.xlu1 %226 }
 0x1c5   :  { %v267_v62 = vsub.f32 %v638_v49, %v243_v56  ;;  %v257_v1 = vmul.f32 0.6931472, %v421_v59  ;;  %424 = vlog2.f32 %v227_v61 }
 0x1c6   :  { %v263_v2 = vsub.f32 %v630_v43, %v235_v60 }
 0x1c7   :  { %283 = vst [vmem:[#allocation2 + $0x38] sm:$0xff] %v267_v62  ;;  %v274_v40 = vsub.f32 %v635_v47, %v257_v1 }
 0x1c8   :  { %279 = vst [vmem:[#allocation2 + $0x18] sm:$0xff] %v263_v2 }
 0x1c9   :  { %290 = vst [vmem:[#allocation2 + $0x70] sm:$0xff] %v274_v40 }
 0x1ca   :  { %v423_v35 = vpop.eup %422 }
 0x1cb   :  { %v425_v63 = vpop.eup %424  ;;  %v255_v5 = vmul.f32 0.6931472, %v423_v35 }
 0x1cc   :  { %v259_v0 = vmul.f32 0.6931472, %v425_v63 }
 0x1cd   :  { %v273_v49 = vsub.f32 %v646_v57, %v255_v5 }
 0x1ce   :  { %v275_v43 = vsub.f32 %v643_v55, %v259_v0 }
 0x1cf   :  { %289 = vst [vmem:[#allocation2 + $0x68] sm:$0xff] %v273_v49 }
 0x1d0   :  { %291 = vst [vmem:[#allocation2 + $0x78] sm:$0xff] %v275_v43 }
 0x1d1   :  { %304 = dma.vmem_to_hbm [thread:$0]  %s297_s2, 2048, %s299_s24, [#allocation3], %s453_s25, %s453_s25, %s454_s26  }
 0x1d2   :  { %450 = dma.done.wait [#allocation3], 2048  }
 0x1d3   :  { %451 = vsyncadd [#allocation3], 4294965248 }
 0x1d4   :  { %309 = vsyncpa [#allocation3], 1 }

// kernel: rnn_lm_forward.2
= control target key start
LH: loop header
LB: loop body
LE: loop exit
PB: predicated region body
PF: predicated region fallthrough
CT: control target
= control target key end

     0   :  { %s2496_s0 = inlined_call_operand.vmem [shape: f32[16,8,128], index: 0, kind: input, shape index: {}]   ;;  %s2497_s1 = inlined_call_operand.vmem [shape: f32[8,128], index: 1, kind: input, shape index: {}]   ;;  %s2498_s2 = inlined_call_operand.vmem [shape: f32[256,128], index: 2, kind: input, shape index: {}]   ;;  %s2499_s3 = inlined_call_operand.vmem [shape: f32[1,128], index: 3, kind: input, shape index: {}]   ;;  %s2500_s4 = inlined_call_operand.vmem [shape: f32[16,8,128], index: 4, kind: output, shape index: {0}]   ;;  %s2501_s5 = inlined_call_operand.hbm [shape: f32[8,128], index: 5, kind: output, shape index: {1}]  }
   0x1   :  { %v1485_v0 = vld [vmem:[%s2498_s2 + $0x78] sm:$0xff]  ;;  %v1490_v1 = vld [vmem:[%s2498_s2 + $0x70] sm:$0xff]  ;;  %v1507_v4 = vld [vmem:[%s2498_s2 + $0x68] sm:$0xff] }
   0x2   :  { %v1495_v2 = vld [vmem:[%s2498_s2 + $0xf8] sm:$0xff]  ;;  %64 = vmatpush.msra.mxu0 %v1485_v0  ;;  %v1502_v3 = vld [vmem:[%s2498_s2 + $0xf0] sm:$0xff]  ;;  %v1512_v5 = vld [vmem:[%s2498_s2 + $0xe8] sm:$0xff]  ;;  %144 = vmatpush.msra.mxu2 %v1485_v0 }
   0x3   :  { %84 = vmatpush.msra.mxu1 %v1495_v2  ;;  %164 = vmatpush.msra.mxu3 %v1495_v2  ;;  %v1521_v6 = vld [vmem:[%s2498_s2 + $0x60] sm:$0xff]  ;;  %v1535_v8 = vld [vmem:[%s2498_s2 + $0x58] sm:$0xff]  ;;  %v1549_v10 = vld [vmem:[%s2498_s2 + $0x50] sm:$0xff] }
   0x4   :  { %65 = vmatpush.msra.mxu0 %v1490_v1  ;;  %v1526_v7 = vld [vmem:[%s2498_s2 + $0xe0] sm:$0xff]  ;;  %145 = vmatpush.msra.mxu2 %v1490_v1  ;;  %v1540_v9 = vld [vmem:[%s2498_s2 + $0xd8] sm:$0xff]  ;;  %v1554_v11 = vld [vmem:[%s2498_s2 + $0xd0] sm:$0xff] }
   0x5   :  { %85 = vmatpush.msra.mxu1 %v1502_v3  ;;  %165 = vmatpush.msra.mxu3 %v1502_v3  ;;  %v1563_v12 = vld [vmem:[%s2498_s2 + $0x48] sm:$0xff]  ;;  %v1577_v14 = vld [vmem:[%s2498_s2 + $0x40] sm:$0xff]  ;;  %v1587_v16 = vld [vmem:[%s2498_s2 + $0x38] sm:$0xff] }
   0x6   :  { %66 = vmatpush.msra.mxu0 %v1507_v4  ;;  %146 = vmatpush.msra.mxu2 %v1507_v4  ;;  %v1568_v13 = vld [vmem:[%s2498_s2 + $0xc8] sm:$0xff]  ;;  %v1582_v15 = vld [vmem:[%s2498_s2 + $0xc0] sm:$0xff]  ;;  %v1592_v17 = vld [vmem:[%s2498_s2 + $0xb8] sm:$0xff] }
   0x7   :  { %86 = vmatpush.msra.mxu1 %v1512_v5  ;;  %166 = vmatpush.msra.mxu3 %v1512_v5  ;;  %v1601_v18 = vld [vmem:[%s2498_s2 + $0x30] sm:$0xff] }
   0x8   :  { %67 = vmatpush.msra.mxu0 %v1521_v6  ;;  %147 = vmatpush.msra.mxu2 %v1521_v6  ;;  %v1606_v19 = vld [vmem:[%s2498_s2 + $0xb0] sm:$0xff] }
   0x9   :  { %87 = vmatpush.msra.mxu1 %v1526_v7  ;;  %167 = vmatpush.msra.mxu3 %v1526_v7 }
   0xa   :  { %68 = vmatpush.msra.mxu0 %v1535_v8  ;;  %148 = vmatpush.msra.mxu2 %v1535_v8 }
   0xb   :  { %88 = vmatpush.msra.mxu1 %v1540_v9  ;;  %168 = vmatpush.msra.mxu3 %v1540_v9 }
   0xc   :  { %69 = vmatpush.msra.mxu0 %v1549_v10  ;;  %149 = vmatpush.msra.mxu2 %v1549_v10 }
   0xd   :  { %89 = vmatpush.msra.mxu1 %v1554_v11  ;;  %169 = vmatpush.msra.mxu3 %v1554_v11 }
   0xe   :  { %70 = vmatpush.msra.mxu0 %v1563_v12  ;;  %150 = vmatpush.msra.mxu2 %v1563_v12 }
   0xf   :  { %90 = vmatpush.msra.mxu1 %v1568_v13  ;;  %170 = vmatpush.msra.mxu3 %v1568_v13 }
  0x10   :  { %71 = vmatpush.msra.mxu0 %v1577_v14  ;;  %151 = vmatpush.msra.mxu2 %v1577_v14 }
  0x11   :  { %91 = vmatpush.msra.mxu1 %v1582_v15  ;;  %171 = vmatpush.msra.mxu3 %v1582_v15 }
  0x12   :  { %72 = vmatpush.msra.mxu0 %v1587_v16 }
  0x13   :  { %92 = vmatpush.msra.mxu1 %v1592_v17 }
  0x14   :  { %11 = vsyncpa [#allocation4], 0  ;;  %v1619_v20 = vld [vmem:[%s2498_s2 + $0x28] sm:$0xff]  ;;  %152 = vmatpush.msra.mxu2 %v1587_v16  ;;  %172 = vmatpush.msra.mxu3 %v1592_v17  ;;  %v1633_v22 = vld [vmem:[%s2498_s2 + $0x20] sm:$0xff]  ;;  %s1335_s24 = sshll.u32 %s2501_s5, 4  ;;  %s1336_s24 = int_to_ptr.hbm [resolvable:$true] %s1335_s24 }
  0x15   :  { %v1624_v21 = vld [vmem:[%s2498_s2 + $0xa8] sm:$0xff]  ;;  %73 = vmatpush.msra.mxu0 %v1601_v18  ;;  %93 = vmatpush.msra.mxu1 %v1606_v19  ;;  %v1638_v23 = vld [vmem:[%s2498_s2 + $0xa0] sm:$0xff]  ;;  %v1647_v24 = vld [vmem:[%s2498_s2 + $0x18] sm:$0xff] }
  0x16   :  { %153 = vmatpush.msra.mxu2 %v1601_v18  ;;  %173 = vmatpush.msra.mxu3 %v1606_v19  ;;  %v1652_v25 = vld [vmem:[%s2498_s2 + $0x98] sm:$0xff]  ;;  %v1661_v26 = vld [vmem:[%s2498_s2 + $0x10] sm:$0xff]  ;;  %v1675_v28 = vld [vmem:[%s2498_s2 + $0x8] sm:$0xff] }
  0x17   :  { %74 = vmatpush.msra.mxu0 %v1619_v20  ;;  %94 = vmatpush.msra.mxu1 %v1624_v21  ;;  %v1666_v27 = vld [vmem:[%s2498_s2 + $0x90] sm:$0xff]  ;;  %v1680_v29 = vld [vmem:[%s2498_s2 + $0x88] sm:$0xff]  ;;  %v1689_v30 = vld [vmem:[%s2498_s2] sm:$0xff] }
  0x18   :  { %154 = vmatpush.msra.mxu2 %v1619_v20  ;;  %174 = vmatpush.msra.mxu3 %v1624_v21  ;;  %v1694_v31 = vld [vmem:[%s2498_s2 + $0x80] sm:$0xff]  ;;  %v1346_v34 = vld [vmem:[%s2496_s0 + $0x8] sm:$0xff]  ;;  %v1348_v41 = vld [vmem:[%s2496_s0 + $0x10] sm:$0xff] }
  0x19   :  { %75 = vmatpush.msra.mxu0 %v1633_v22  ;;  %95 = vmatpush.msra.mxu1 %v1638_v23  ;;  %v27_v32 = vld [vmem:[%s2496_s0] sm:$0xff]  ;;  %v1350_v48 = vld [vmem:[%s2496_s0 + $0x18] sm:$0xff]  ;;  %v1354_v62 = vld [vmem:[%s2496_s0 + $0x28] sm:$0xff] }
  0x1a   :  { %155 = vmatpush.msra.mxu2 %v1633_v22  ;;  %175 = vmatpush.msra.mxu3 %v1638_v23  ;;  %v24_v33 = vld [vmem:[%s2497_s1] sm:$0xff] }
  0x1b   :  { %76 = vmatpush.msra.mxu0 %v1647_v24  ;;  %96 = vmatpush.msra.mxu1 %v1652_v25  ;;  %v1377_v35 = vld [vmem:[%s2499_s3] ss:$0 sm:$0xff] }
  0x1c   :  { %156 = vmatpush.msra.mxu2 %v1647_v24  ;;  %176 = vmatpush.msra.mxu3 %v1652_v25  ;;  %v1378_v42 = vld [vmem:[%s2499_s3] ss:$0 sm:$0xff] }
  0x1d   :  { %77 = vmatpush.msra.mxu0 %v1661_v26  ;;  %97 = vmatpush.msra.mxu1 %v1666_v27  ;;  %v1379_v49 = vld [vmem:[%s2499_s3] ss:$0 sm:$0xff] }
  0x1e   :  { %157 = vmatpush.msra.mxu2 %v1661_v26  ;;  %177 = vmatpush.msra.mxu3 %v1666_v27  ;;  %v1352_v55 = vld [vmem:[%s2496_s0 + $0x20] sm:$0xff] }
  0x1f   :  { %78 = vmatpush.msra.mxu0 %v1675_v28  ;;  %98 = vmatpush.msra.mxu1 %v1680_v29  ;;  %v1380_v56 = vld [vmem:[%s2499_s3] ss:$0 sm:$0xff] }
  0x20   :  { %158 = vmatpush.msra.mxu2 %v1675_v28  ;;  %178 = vmatpush.msra.mxu3 %v1680_v29  ;;  %v1381_v63 = vld [vmem:[%s2499_s3] ss:$0 sm:$0xff] }
  0x21   :  { %79 = vmatpush.msra.mxu0 %v1689_v30  ;;  %99 = vmatpush.msra.mxu1 %v1694_v31 }
  0x22   :  { %80 = vmatmul.f32.vlgmr.msra.gmra.mxu0 %v27_v32  ;;  %100 = vmatmul.f32.vlgmr.msra.gmra.mxu1 %v24_v33  ;;  %v2076_v33 = vld [vmem:[%s2498_s2 + $0x20] sm:$0xff] }
  0x23   :  { %159 = vmatpush.msra.mxu2 %v1689_v30  ;;  %179 = vmatpush.msra.mxu3 %v1694_v31 }
  0x24   :  { %225 = vmatpush.msrb.mxu0 %v1485_v0  ;;  %245 = vmatpush.msrb.mxu1 %v1495_v2 }
  0x25   :  { %306 = vmatpush.msrb.mxu2 %v1485_v0  ;;  %326 = vmatpush.msrb.mxu3 %v1495_v2 }
  0x26   :  { %226 = vmatpush.msrb.mxu0 %v1490_v1  ;;  %246 = vmatpush.msrb.mxu1 %v1502_v3 }
  0x27   :  { %307 = vmatpush.msrb.mxu2 %v1490_v1  ;;  %327 = vmatpush.msrb.mxu3 %v1502_v3 }
  0x28   :  { %227 = vmatpush.msrb.mxu0 %v1507_v4  ;;  %247 = vmatpush.msrb.mxu1 %v1512_v5 }
  0x29   :  { %308 = vmatpush.msrb.mxu2 %v1507_v4  ;;  %328 = vmatpush.msrb.mxu3 %v1512_v5 }
  0x2a   :  { %228 = vmatpush.msrb.mxu0 %v1521_v6  ;;  %248 = vmatpush.msrb.mxu1 %v1526_v7 }
  0x2b   :  { %309 = vmatpush.msrb.mxu2 %v1521_v6  ;;  %329 = vmatpush.msrb.mxu3 %v1526_v7 }
  0x2c   :  { %229 = vmatpush.msrb.mxu0 %v1535_v8  ;;  %249 = vmatpush.msrb.mxu1 %v1540_v9 }
  0x2d   :  { %310 = vmatpush.msrb.mxu2 %v1535_v8  ;;  %330 = vmatpush.msrb.mxu3 %v1540_v9 }
  0x2e   :  { %230 = vmatpush.msrb.mxu0 %v1549_v10  ;;  %250 = vmatpush.msrb.mxu1 %v1554_v11 }
  0x2f   :  { %311 = vmatpush.msrb.mxu2 %v1549_v10  ;;  %331 = vmatpush.msrb.mxu3 %v1554_v11 }
  0x30   :  { %231 = vmatpush.msrb.mxu0 %v1563_v12  ;;  %251 = vmatpush.msrb.mxu1 %v1568_v13 }
  0x31   :  { %312 = vmatpush.msrb.mxu2 %v1563_v12  ;;  %332 = vmatpush.msrb.mxu3 %v1568_v13 }
  0x32   :  { %232 = vmatpush.msrb.mxu0 %v1577_v14  ;;  %252 = vmatpush.msrb.mxu1 %v1582_v15 }
  0x33   :  { %313 = vmatpush.msrb.mxu2 %v1577_v14  ;;  %333 = vmatpush.msrb.mxu3 %v1582_v15 }
  0x34   :  { %233 = vmatpush.msrb.mxu0 %v1587_v16  ;;  %253 = vmatpush.msrb.mxu1 %v1592_v17 }
  0x35   :  { %314 = vmatpush.msrb.mxu2 %v1587_v16  ;;  %334 = vmatpush.msrb.mxu3 %v1592_v17 }
  0x36   :  { %234 = vmatpush.msrb.mxu0 %v1601_v18  ;;  %254 = vmatpush.msrb.mxu1 %v1606_v19 }
  0x37   :  { %315 = vmatpush.msrb.mxu2 %v1601_v18  ;;  %335 = vmatpush.msrb.mxu3 %v1606_v19 }
  0x38   :  { %235 = vmatpush.msrb.mxu0 %v1619_v20  ;;  %255 = vmatpush.msrb.mxu1 %v1624_v21 }
  0x39   :  { %316 = vmatpush.msrb.mxu2 %v1619_v20  ;;  %336 = vmatpush.msrb.mxu3 %v1624_v21 }
  0x3a   :  { %236 = vmatpush.msrb.mxu0 %v1633_v22  ;;  %256 = vmatpush.msrb.mxu1 %v1638_v23 }
  0x3b   :  { %317 = vmatpush.msrb.mxu2 %v1633_v22  ;;  %337 = vmatpush.msrb.mxu3 %v1638_v23 }
  0x3c   :  { %237 = vmatpush.msrb.mxu0 %v1647_v24  ;;  %257 = vmatpush.msrb.mxu1 %v1652_v25 }
  0x3d   :  { %318 = vmatpush.msrb.mxu2 %v1647_v24  ;;  %338 = vmatpush.msrb.mxu3 %v1652_v25 }
  0x3e   :  { %238 = vmatpush.msrb.mxu0 %v1661_v26  ;;  %258 = vmatpush.msrb.mxu1 %v1666_v27 }
  0x3f   :  { %319 = vmatpush.msrb.mxu2 %v1661_v26  ;;  %339 = vmatpush.msrb.mxu3 %v1666_v27 }
  0x40   :  { %239 = vmatpush.msrb.mxu0 %v1675_v28  ;;  %259 = vmatpush.msrb.mxu1 %v1680_v29 }
  0x41   :  { %320 = vmatpush.msrb.mxu2 %v1675_v28  ;;  %340 = vmatpush.msrb.mxu3 %v1680_v29 }
  0x42   :  { %240 = vmatpush.msrb.mxu0 %v1689_v30  ;;  %260 = vmatpush.msrb.mxu1 %v1694_v31 }
  0x43   :  { %321 = vmatpush.msrb.mxu2 %v1689_v30  ;;  %341 = vmatpush.msrb.mxu3 %v1694_v31 }
  0x44   :  { %387 = vmatpush.msra.mxu0 %v1485_v0  ;;  %407 = vmatpush.msra.mxu1 %v1495_v2 }
  0x45   :  { %160 = vmatmul.f32.vlgmr.msra.gmra.mxu2 %v1346_v34  ;;  %241 = vmatmul.f32.vlgmr.msrb.gmra.mxu0 %v1348_v41  ;;  %v2081_v34 = vld [vmem:[%s2498_s2 + $0xa8] sm:$0xff]  ;;  %v2130_v41 = vld [vmem:[%s2498_s2] sm:$0xff] }
  0x46   :  { %388 = vmatpush.msra.mxu0 %v1490_v1  ;;  %408 = vmatpush.msra.mxu1 %v1502_v3 }
  0x47   :  { %468 = vmatpush.msra.mxu2 %v1485_v0 }
  0x48   :  { %389 = vmatpush.msra.mxu0 %v1507_v4  ;;  %409 = vmatpush.msra.mxu1 %v1512_v5 }
  0x49   :  { %469 = vmatpush.msra.mxu2 %v1490_v1 }
  0x4a   :  { %390 = vmatpush.msra.mxu0 %v1521_v6  ;;  %410 = vmatpush.msra.mxu1 %v1526_v7 }
  0x4b   :  { %470 = vmatpush.msra.mxu2 %v1507_v4 }
  0x4c   :  { %391 = vmatpush.msra.mxu0 %v1535_v8  ;;  %411 = vmatpush.msra.mxu1 %v1540_v9 }
  0x4d   :  { %471 = vmatpush.msra.mxu2 %v1521_v6 }
  0x4e   :  { %392 = vmatpush.msra.mxu0 %v1549_v10  ;;  %412 = vmatpush.msra.mxu1 %v1554_v11 }
  0x4f   :  { %472 = vmatpush.msra.mxu2 %v1535_v8 }
  0x50   :  { %393 = vmatpush.msra.mxu0 %v1563_v12  ;;  %413 = vmatpush.msra.mxu1 %v1568_v13 }
  0x51   :  { %473 = vmatpush.msra.mxu2 %v1549_v10 }
  0x52   :  { %394 = vmatpush.msra.mxu0 %v1577_v14  ;;  %414 = vmatpush.msra.mxu1 %v1582_v15 }
  0x53   :  { %474 = vmatpush.msra.mxu2 %v1563_v12 }
  0x54   :  { %395 = vmatpush.msra.mxu0 %v1587_v16  ;;  %415 = vmatpush.msra.mxu1 %v1592_v17 }
  0x55   :  { %475 = vmatpush.msra.mxu2 %v1577_v14 }
  0x56   :  { %396 = vmatpush.msra.mxu0 %v1601_v18  ;;  %416 = vmatpush.msra.mxu1 %v1606_v19 }
  0x57   :  { %476 = vmatpush.msra.mxu2 %v1587_v16 }
  0x58   :  { %397 = vmatpush.msra.mxu0 %v1619_v20  ;;  %417 = vmatpush.msra.mxu1 %v1624_v21 }
  0x59   :  { %477 = vmatpush.msra.mxu2 %v1601_v18 }
  0x5a   :  { %398 = vmatpush.msra.mxu0 %v1633_v22  ;;  %418 = vmatpush.msra.mxu1 %v1638_v23 }
  0x5b   :  { %478 = vmatpush.msra.mxu2 %v1619_v20 }
  0x5c   :  { %399 = vmatpush.msra.mxu0 %v1647_v24  ;;  %419 = vmatpush.msra.mxu1 %v1652_v25 }
  0x5d   :  { %479 = vmatpush.msra.mxu2 %v1633_v22 }
  0x5e   :  { %400 = vmatpush.msra.mxu0 %v1661_v26  ;;  %420 = vmatpush.msra.mxu1 %v1666_v27 }
  0x5f   :  { %480 = vmatpush.msra.mxu2 %v1647_v24 }
  0x60   :  { %401 = vmatpush.msra.mxu0 %v1675_v28  ;;  %421 = vmatpush.msra.mxu1 %v1680_v29 }
  0x61   :  { %481 = vmatpush.msra.mxu2 %v1661_v26 }
  0x62   :  { %402 = vmatpush.msra.mxu0 %v1689_v30  ;;  %422 = vmatpush.msra.mxu1 %v1694_v31 }
  0x63   :  { %482 = vmatpush.msra.mxu2 %v1675_v28  ;;  %403 = vmatmul.f32.vlgmr.msra.gmra.mxu0 %v1352_v55 }
  0x64   :  { %549 = vmatpush.msrb.mxu0 %v1485_v0  ;;  %322 = vmatmul.f32.vlgmr.msrb.gmra.mxu2 %v1350_v48 }
  0x65   :  { %483 = vmatpush.msra.mxu2 %v1689_v30 }
  0x66   :  { %550 = vmatpush.msrb.mxu0 %v1490_v1 }
  0x68   :  { %551 = vmatpush.msrb.mxu0 %v1507_v4 }
  0x6a   :  { %552 = vmatpush.msrb.mxu0 %v1521_v6  ;;  %v1923_v6 = vld [vmem:[%s2498_s2 + $0x78] sm:$0xff] }
  0x6b   :  { %630 = vmatpush.msrb.mxu2 %v1923_v6 }
  0x6c   :  { %553 = vmatpush.msrb.mxu0 %v1535_v8  ;;  %484 = vmatmul.f32.vlgmr.msra.gmra.mxu2 %v1354_v62  ;;  %v1933_v8 = vld [vmem:[%s2498_s2 + $0xf8] sm:$0xff] }
  0x6e   :  { %554 = vmatpush.msrb.mxu0 %v1549_v10  ;;  %v1945_v10 = vld [vmem:[%s2498_s2 + $0x68] sm:$0xff] }
  0x70   :  { %555 = vmatpush.msrb.mxu0 %v1563_v12  ;;  %v1959_v12 = vld [vmem:[%s2498_s2 + $0x60] sm:$0xff] }
  0x72   :  { %556 = vmatpush.msrb.mxu0 %v1577_v14  ;;  %v1973_v14 = vld [vmem:[%s2498_s2 + $0x58] sm:$0xff] }
  0x74   :  { %557 = vmatpush.msrb.mxu0 %v1587_v16  ;;  %v1987_v16 = vld [vmem:[%s2498_s2 + $0x50] sm:$0xff] }
  0x76   :  { %558 = vmatpush.msrb.mxu0 %v1601_v18  ;;  %v2001_v18 = vld [vmem:[%s2498_s2 + $0x48] sm:$0xff] }
  0x78   :  { %559 = vmatpush.msrb.mxu0 %v1619_v20  ;;  %v2015_v20 = vld [vmem:[%s2498_s2 + $0x40] sm:$0xff] }
  0x7a   :  { %560 = vmatpush.msrb.mxu0 %v1633_v22  ;;  %v2029_v22 = vld [vmem:[%s2498_s2 + $0x38] sm:$0xff] }
  0x7c   :  { %561 = vmatpush.msrb.mxu0 %v1647_v24  ;;  %v1382_v24 = vld [vmem:[%s2499_s3] ss:$0 sm:$0xff] }
  0x7e   :  { %562 = vmatpush.msrb.mxu0 %v1661_v26  ;;  %v2046_v26 = vld [vmem:[%s2498_s2 + $0x30] sm:$0xff] }
  0x80   :  { %563 = vmatpush.msrb.mxu0 %v1675_v28  ;;  %v2060_v28 = vld [vmem:[%s2498_s2 + $0x28] sm:$0xff] }
  0x82   :  { %564 = vmatpush.msrb.mxu0 %v1689_v30 }
  0x84   :  { %711 = vmatpush.msra.mxu0 %v1923_v6 }
  0x9f   :  { %v81_v36 = vpop.f32.mrf.mxu0  ;;  %v101_v37 = vpop.f32.mrf.mxu1 }
  0xa0   :  { %v82_v38 = vadd.f32 %v1377_v35, %v81_v36  ;;  %v2090_v35 = vld [vmem:[%s2498_s2 + $0x18] sm:$0xff]  ;;  %v2095_v36 = vld [vmem:[%s2498_s2 + $0xa0] sm:$0xff] }
  0xa2   :  { %v102_v39 = vadd.f32 %v101_v37, %v82_v38  ;;  %v2102_v37 = vld [vmem:[%s2498_s2 + $0x10] sm:$0xff]  ;;  %v2107_v38 = vld [vmem:[%s2498_s2 + $0x98] sm:$0xff] }
  0xa4   :  { %1393 = vtanh.f32 %v102_v39  ;;  %v2116_v39 = vld [vmem:[%s2498_s2 + $0x8] sm:$0xff] }
  0xaa   :  { %v1394_v40 = vpop.eup %1393 }
  0xab   :  { %105 = vst [vmem:[%s2500_s4] sm:$0xff] %v1394_v40  ;;  %180 = vmatmul.f32.vlgmr.msra.gmra.mxu3 %v1394_v40  ;;  %v2121_v40 = vld [vmem:[%s2498_s2 + $0x90] sm:$0xff] }
  0xac   :  { %488 = vmatpush.msra.mxu3 %v1495_v2 }
  0xae   :  { %489 = vmatpush.msra.mxu3 %v1502_v3 }
  0xb0   :  { %490 = vmatpush.msra.mxu3 %v1512_v5 }
  0xb2   :  { %491 = vmatpush.msra.mxu3 %v1526_v7 }
  0xb4   :  { %492 = vmatpush.msra.mxu3 %v1540_v9 }
  0xb6   :  { %493 = vmatpush.msra.mxu3 %v1554_v11 }
  0xb8   :  { %494 = vmatpush.msra.mxu3 %v1568_v13 }
  0xba   :  { %495 = vmatpush.msra.mxu3 %v1582_v15 }
  0xbc   :  { %496 = vmatpush.msra.mxu3 %v1592_v17 }
  0xbe   :  { %497 = vmatpush.msra.mxu3 %v1606_v19 }
  0xc0   :  { %498 = vmatpush.msra.mxu3 %v1624_v21 }
  0xc2   :  { %499 = vmatpush.msra.mxu3 %v1638_v23  ;;  %v242_v50 = vpop.f32.mrf.mxu0 }
  0xc3   :  { %v243_v51 = vadd.f32 %v1379_v49, %v242_v50 }
  0xc4   :  { %500 = vmatpush.msra.mxu3 %v1652_v25 }
  0xc6   :  { %501 = vmatpush.msra.mxu3 %v1666_v27 }
  0xc8   :  { %502 = vmatpush.msra.mxu3 %v1680_v29  ;;  %v161_v43 = vpop.f32.mrf.mxu2 }
  0xc9   :  { %v162_v44 = vadd.f32 %v1378_v42, %v161_v43  ;;  %v2135_v42 = vld [vmem:[%s2498_s2 + $0x88] sm:$0xff]  ;;  %v1358_v43 = vld [vmem:[%s2496_s0 + $0x38] sm:$0xff] }
  0xca   :  { %503 = vmatpush.msra.mxu3 %v1694_v31 }
  0xe0   :  { %v404_v0 = vpop.f32.mrf.mxu0 }
  0xe1   :  { %v405_v1 = vadd.f32 %v1381_v63, %v404_v0 }
  0xe7   :  { %v323_v57 = vpop.f32.mrf.mxu2 }
  0xe8   :  { %v324_v58 = vadd.f32 %v1380_v56, %v323_v57 }
 0x12e   :  { %v181_v45 = vpop.f32.mrf.mxu3 }
 0x12f   :  { %v182_v46 = vadd.f32 %v181_v45, %v162_v44  ;;  %v2147_v44 = vld [vmem:[%s2498_s2 + $0x80] sm:$0xff] }
 0x130   :  { %v1383_v45 = vld [vmem:[%s2499_s3] ss:$0 sm:$0xff] }
 0x131   :  { %1395 = vtanh.f32 %v182_v46 }
 0x137   :  { %v1396_v47 = vpop.eup %1395 }
 0x138   :  { %1347 = vst [vmem:[%s2500_s4 + $0x8] sm:$0xff] %v1396_v47  ;;  %261 = vmatmul.f32.vlgmr.msrb.gmra.mxu1 %v1396_v47 }
 0x139   :  { %569 = vmatpush.msrb.mxu1 %v1495_v2 }
 0x13b   :  { %570 = vmatpush.msrb.mxu1 %v1502_v3 }
 0x13d   :  { %571 = vmatpush.msrb.mxu1 %v1512_v5  ;;  %v1356_v5 = vld [vmem:[%s2496_s0 + $0x30] sm:$0xff] }
 0x13e   :  { %565 = vmatmul.f32.vlgmr.msrb.gmra.mxu0 %v1356_v5 }
 0x13f   :  { %572 = vmatpush.msrb.mxu1 %v1526_v7  ;;  %v1928_v7 = vld [vmem:[%s2498_s2 + $0x70] sm:$0xff] }
 0x140   :  { %631 = vmatpush.msrb.mxu2 %v1928_v7  ;;  %712 = vmatpush.msra.mxu0 %v1928_v7 }
 0x141   :  { %573 = vmatpush.msrb.mxu1 %v1540_v9  ;;  %v1940_v9 = vld [vmem:[%s2498_s2 + $0xf0] sm:$0xff] }
 0x142   :  { %632 = vmatpush.msrb.mxu2 %v1945_v10  ;;  %713 = vmatpush.msra.mxu0 %v1945_v10 }
 0x143   :  { %574 = vmatpush.msrb.mxu1 %v1554_v11  ;;  %v1950_v11 = vld [vmem:[%s2498_s2 + $0xe8] sm:$0xff] }
 0x144   :  { %633 = vmatpush.msrb.mxu2 %v1959_v12  ;;  %714 = vmatpush.msra.mxu0 %v1959_v12 }
 0x145   :  { %575 = vmatpush.msrb.mxu1 %v1568_v13  ;;  %v1964_v13 = vld [vmem:[%s2498_s2 + $0xe0] sm:$0xff] }
 0x146   :  { %634 = vmatpush.msrb.mxu2 %v1973_v14  ;;  %715 = vmatpush.msra.mxu0 %v1973_v14 }
 0x147   :  { %576 = vmatpush.msrb.mxu1 %v1582_v15  ;;  %v1978_v15 = vld [vmem:[%s2498_s2 + $0xd8] sm:$0xff] }
 0x148   :  { %635 = vmatpush.msrb.mxu2 %v1987_v16  ;;  %716 = vmatpush.msra.mxu0 %v1987_v16 }
 0x149   :  { %577 = vmatpush.msrb.mxu1 %v1592_v17  ;;  %v1992_v17 = vld [vmem:[%s2498_s2 + $0xd0] sm:$0xff] }
 0x14a   :  { %636 = vmatpush.msrb.mxu2 %v2001_v18  ;;  %717 = vmatpush.msra.mxu0 %v2001_v18 }
 0x14b   :  { %578 = vmatpush.msrb.mxu1 %v1606_v19  ;;  %v2006_v19 = vld [vmem:[%s2498_s2 + $0xc8] sm:$0xff] }
 0x14c   :  { %637 = vmatpush.msrb.mxu2 %v2015_v20  ;;  %718 = vmatpush.msra.mxu0 %v2015_v20 }
 0x14d   :  { %579 = vmatpush.msrb.mxu1 %v1624_v21  ;;  %v2020_v21 = vld [vmem:[%s2498_s2 + $0xc0] sm:$0xff] }
 0x14e   :  { %638 = vmatpush.msrb.mxu2 %v2029_v22  ;;  %719 = vmatpush.msra.mxu0 %v2029_v22 }
 0x14f   :  { %580 = vmatpush.msrb.mxu1 %v1638_v23  ;;  %v2034_v23 = vld [vmem:[%s2498_s2 + $0xb8] sm:$0xff] }
 0x150   :  { %639 = vmatpush.msrb.mxu2 %v2046_v26  ;;  %720 = vmatpush.msra.mxu0 %v2046_v26 }
 0x151   :  { %581 = vmatpush.msrb.mxu1 %v1652_v25  ;;  %v485_v25 = vpop.f32.mrf.mxu2 }
 0x152   :  { %640 = vmatpush.msrb.mxu2 %v2060_v28  ;;  %721 = vmatpush.msra.mxu0 %v2060_v28 }
 0x153   :  { %582 = vmatpush.msrb.mxu1 %v1666_v27  ;;  %v2051_v27 = vld [vmem:[%s2498_s2 + $0xb0] sm:$0xff] }
 0x154   :  { %641 = vmatpush.msrb.mxu2 %v2076_v33  ;;  %722 = vmatpush.msra.mxu0 %v2076_v33 }
 0x155   :  { %583 = vmatpush.msrb.mxu1 %v1680_v29  ;;  %v486_v29 = vadd.f32 %v1382_v24, %v485_v25  ;;  %v1175_v24 = vld [vmem:[%s2498_s2 + $0x70] sm:$0xff]  ;;  %v1192_v25 = vld [vmem:[%s2498_s2 + $0xf8] sm:$0xff] }
 0x156   :  { %642 = vmatpush.msrb.mxu2 %v2090_v35  ;;  %723 = vmatpush.msra.mxu0 %v2090_v35 }
 0x157   :  { %584 = vmatpush.msrb.mxu1 %v1694_v31 }
 0x158   :  { %643 = vmatpush.msrb.mxu2 %v2102_v37  ;;  %724 = vmatpush.msra.mxu0 %v2102_v37 }
 0x15a   :  { %644 = vmatpush.msrb.mxu2 %v2116_v39  ;;  %725 = vmatpush.msra.mxu0 %v2116_v39 }
 0x15c   :  { %645 = vmatpush.msrb.mxu2 %v2130_v41  ;;  %726 = vmatpush.msra.mxu0 %v2130_v41 }
 0x15d   :  { %646 = vmatmul.f32.vlgmr.msrb.gmra.mxu2 %v1358_v43  ;;  %v1167_v43 = vld [vmem:[%s2498_s2 + $0x30] sm:$0xff] }
 0x15e   :  { %792 = vmatpush.msra.mxu2 %v1923_v6  ;;  %873 = vmatpush.msrb.mxu0 %v1923_v6 }
 0x160   :  { %793 = vmatpush.msra.mxu2 %v1928_v7  ;;  %874 = vmatpush.msrb.mxu0 %v1928_v7 }
 0x162   :  { %794 = vmatpush.msra.mxu2 %v1945_v10  ;;  %875 = vmatpush.msrb.mxu0 %v1945_v10 }
 0x164   :  { %795 = vmatpush.msra.mxu2 %v1959_v12  ;;  %876 = vmatpush.msrb.mxu0 %v1959_v12 }
 0x166   :  { %796 = vmatpush.msra.mxu2 %v1973_v14  ;;  %877 = vmatpush.msrb.mxu0 %v1973_v14 }
 0x168   :  { %797 = vmatpush.msra.mxu2 %v1987_v16  ;;  %878 = vmatpush.msrb.mxu0 %v1987_v16 }
 0x16a   :  { %798 = vmatpush.msra.mxu2 %v2001_v18  ;;  %879 = vmatpush.msrb.mxu0 %v2001_v18 }
 0x16c   :  { %799 = vmatpush.msra.mxu2 %v2015_v20  ;;  %880 = vmatpush.msrb.mxu0 %v2015_v20 }
 0x16e   :  { %800 = vmatpush.msra.mxu2 %v2029_v22  ;;  %881 = vmatpush.msrb.mxu0 %v2029_v22 }
 0x170   :  { %801 = vmatpush.msra.mxu2 %v2046_v26  ;;  %882 = vmatpush.msrb.mxu0 %v2046_v26 }
 0x172   :  { %802 = vmatpush.msra.mxu2 %v2060_v28  ;;  %883 = vmatpush.msrb.mxu0 %v2060_v28 }
 0x174   :  { %803 = vmatpush.msra.mxu2 %v2076_v33  ;;  %884 = vmatpush.msrb.mxu0 %v2076_v33 }
 0x176   :  { %804 = vmatpush.msra.mxu2 %v2090_v35  ;;  %885 = vmatpush.msrb.mxu0 %v2090_v35 }
 0x178   :  { %805 = vmatpush.msra.mxu2 %v2102_v37  ;;  %886 = vmatpush.msrb.mxu0 %v2102_v37 }
 0x17a   :  { %806 = vmatpush.msra.mxu2 %v2116_v39  ;;  %887 = vmatpush.msrb.mxu0 %v2116_v39 }
 0x17c   :  { %807 = vmatpush.msra.mxu2 %v2130_v41  ;;  %888 = vmatpush.msrb.mxu0 %v2130_v41 }
 0x17e   :  { %954 = vmatpush.msrb.mxu2 %v1923_v6 }
 0x180   :  { %955 = vmatpush.msrb.mxu2 %v1928_v7 }
 0x182   :  { %956 = vmatpush.msrb.mxu2 %v1945_v10 }
 0x184   :  { %957 = vmatpush.msrb.mxu2 %v1959_v12 }
 0x186   :  { %958 = vmatpush.msrb.mxu2 %v1973_v14 }
 0x188   :  { %959 = vmatpush.msrb.mxu2 %v1987_v16 }
 0x18a   :  { %960 = vmatpush.msrb.mxu2 %v2001_v18 }
 0x18c   :  { %961 = vmatpush.msrb.mxu2 %v2015_v20 }
 0x18e   :  { %962 = vmatpush.msrb.mxu2 %v2029_v22 }
 0x190   :  { %963 = vmatpush.msrb.mxu2 %v2046_v26 }
 0x192   :  { %964 = vmatpush.msrb.mxu2 %v2060_v28 }
 0x194   :  { %965 = vmatpush.msrb.mxu2 %v2076_v33 }
 0x196   :  { %966 = vmatpush.msrb.mxu2 %v2090_v35 }
 0x198   :  { %967 = vmatpush.msrb.mxu2 %v2102_v37 }
 0x19a   :  { %968 = vmatpush.msrb.mxu2 %v2116_v39 }
 0x19c   :  { %969 = vmatpush.msrb.mxu2 %v2130_v41 }
 0x1b5   :  { %v262_v52 = vpop.f32.mrf.mxu1 }
 0x1b6   :  { %v263_v53 = vadd.f32 %v262_v52, %v243_v51  ;;  %v1360_v51 = vld [vmem:[%s2496_s0 + $0x40] sm:$0xff] }
 0x1b7   :  { %727 = vmatmul.f32.vlgmr.msra.gmra.mxu0 %v1360_v51  ;;  %v1384_v52 = vld [vmem:[%s2499_s3] ss:$0 sm:$0xff]  ;;  %v1182_v51 = vld [vmem:[%s2498_s2 + $0xa8] sm:$0xff] }
 0x1b8   :  { %1397 = vtanh.f32 %v263_v53  ;;  %1035 = vmatpush.msra.mxu0 %v1923_v6 }
 0x1ba   :  { %1036 = vmatpush.msra.mxu0 %v1928_v7 }
 0x1bb   :  { %v566_v46 = vpop.f32.mrf.mxu0 }
 0x1bc   :  { %v567_v47 = vadd.f32 %v1383_v45, %v566_v46  ;;  %1037 = vmatpush.msra.mxu0 %v1945_v10  ;;  %v1166_v45 = vld [vmem:[%s2498_s2 + $0x28] sm:$0xff] }
 0x1be   :  { %v1398_v54 = vpop.eup %1397  ;;  %1038 = vmatpush.msra.mxu0 %v1959_v12 }
 0x1bf   :  { %1349 = vst [vmem:[%s2500_s4 + $0x10] sm:$0xff] %v1398_v54  ;;  %342 = vmatmul.f32.vlgmr.msrb.gmra.mxu3 %v1398_v54 }
 0x1c0   :  { %650 = vmatpush.msrb.mxu3 %v1933_v8  ;;  %1039 = vmatpush.msra.mxu0 %v1973_v14 }
 0x1c2   :  { %651 = vmatpush.msrb.mxu3 %v1940_v9  ;;  %1040 = vmatpush.msra.mxu0 %v1987_v16 }
 0x1c4   :  { %652 = vmatpush.msrb.mxu3 %v1950_v11  ;;  %1041 = vmatpush.msra.mxu0 %v2001_v18 }
 0x1c6   :  { %653 = vmatpush.msrb.mxu3 %v1964_v13  ;;  %1042 = vmatpush.msra.mxu0 %v2015_v20 }
 0x1c8   :  { %654 = vmatpush.msrb.mxu3 %v1978_v15  ;;  %1043 = vmatpush.msra.mxu0 %v2029_v22 }
 0x1ca   :  { %655 = vmatpush.msrb.mxu3 %v1992_v17  ;;  %1044 = vmatpush.msra.mxu0 %v2046_v26 }
 0x1cc   :  { %656 = vmatpush.msrb.mxu3 %v2006_v19  ;;  %1045 = vmatpush.msra.mxu0 %v2060_v28 }
 0x1ce   :  { %657 = vmatpush.msrb.mxu3 %v2020_v21  ;;  %1046 = vmatpush.msra.mxu0 %v2076_v33 }
 0x1d0   :  { %658 = vmatpush.msrb.mxu3 %v2034_v23  ;;  %1047 = vmatpush.msra.mxu0 %v2090_v35 }
 0x1d2   :  { %659 = vmatpush.msrb.mxu3 %v2051_v27  ;;  %1048 = vmatpush.msra.mxu0 %v2102_v37 }
 0x1d4   :  { %660 = vmatpush.msrb.mxu3 %v2081_v34  ;;  %1049 = vmatpush.msra.mxu0 %v2116_v39 }
 0x1d6   :  { %661 = vmatpush.msrb.mxu3 %v2095_v36  ;;  %1050 = vmatpush.msra.mxu0 %v2130_v41 }
 0x1d8   :  { %662 = vmatpush.msrb.mxu3 %v2107_v38 }
 0x1da   :  { %663 = vmatpush.msrb.mxu3 %v2121_v40 }
 0x1dc   :  { %664 = vmatpush.msrb.mxu3 %v2135_v42 }
 0x1de   :  { %665 = vmatpush.msrb.mxu3 %v2147_v44 }
 0x1e0   :  { %v647_v53 = vpop.f32.mrf.mxu2 }
 0x1e1   :  { %v648_v54 = vadd.f32 %v1384_v52, %v647_v53  ;;  %v1164_v52 = vld [vmem:[%s2498_s2 + $0x18] sm:$0xff]  ;;  %v1181_v53 = vld [vmem:[%s2498_s2 + $0xa0] sm:$0xff] }
 0x242   :  { %v343_v59 = vpop.f32.mrf.mxu3 }
 0x243   :  { %v344_v60 = vadd.f32 %v343_v59, %v324_v58  ;;  %v1362_v58 = vld [vmem:[%s2496_s0 + $0x48] sm:$0xff]  ;;  %v1385_v59 = vld [vmem:[%s2499_s3] ss:$0 sm:$0xff] }
 0x244   :  { %808 = vmatmul.f32.vlgmr.msra.gmra.mxu2 %v1362_v58  ;;  %v1161_v58 = vld [vmem:[%s2498_s2] sm:$0xff] }
 0x245   :  { %1399 = vtanh.f32 %v344_v60  ;;  %1116 = vmatpush.msra.mxu2 %v1923_v6  ;;  %v728_v60 = vpop.f32.mrf.mxu0 }
 0x247   :  { %1117 = vmatpush.msra.mxu2 %v1928_v7 }
 0x249   :  { %1118 = vmatpush.msra.mxu2 %v1945_v10 }
 0x24b   :  { %v1400_v61 = vpop.eup %1399  ;;  %1119 = vmatpush.msra.mxu2 %v1959_v12 }
 0x24c   :  { %1351 = vst [vmem:[%s2500_s4 + $0x18] sm:$0xff] %v1400_v61  ;;  %423 = vmatmul.f32.vlgmr.msra.gmra.mxu1 %v1400_v61  ;;  %v729_v61 = vadd.f32 %v1385_v59, %v728_v60  ;;  %v1178_v59 = vld [vmem:[%s2498_s2 + $0x88] sm:$0xff]  ;;  %v1372_v60 = vld [vmem:[%s2496_s0 + $0x70] sm:$0xff] }
 0x24d   :  { %731 = vmatpush.msra.mxu1 %v1933_v8  ;;  %1120 = vmatpush.msra.mxu2 %v1973_v14 }
 0x24f   :  { %732 = vmatpush.msra.mxu1 %v1940_v9  ;;  %1121 = vmatpush.msra.mxu2 %v1987_v16  ;;  %v1388_v16 = vld [vmem:[%s2499_s3] ss:$0 sm:$0xff] }
 0x251   :  { %733 = vmatpush.msra.mxu1 %v1950_v11  ;;  %1122 = vmatpush.msra.mxu2 %v2001_v18 }
 0x253   :  { %734 = vmatpush.msra.mxu1 %v1964_v13  ;;  %1123 = vmatpush.msra.mxu2 %v2015_v20 }
 0x255   :  { %735 = vmatpush.msra.mxu1 %v1978_v15  ;;  %1124 = vmatpush.msra.mxu2 %v2029_v22  ;;  %v1370_v22 = vld [vmem:[%s2496_s0 + $0x68] sm:$0xff] }
 0x257   :  { %736 = vmatpush.msra.mxu1 %v1992_v17  ;;  %1125 = vmatpush.msra.mxu2 %v2046_v26  ;;  %v1191_v26 = vld [vmem:[%s2498_s2 + $0xf0] sm:$0xff] }
 0x259   :  { %737 = vmatpush.msra.mxu1 %v2006_v19  ;;  %1126 = vmatpush.msra.mxu2 %v2060_v28  ;;  %v1190_v28 = vld [vmem:[%s2498_s2 + $0xe8] sm:$0xff] }
 0x25b   :  { %738 = vmatpush.msra.mxu1 %v2020_v21  ;;  %1127 = vmatpush.msra.mxu2 %v2076_v33  ;;  %v1171_v33 = vld [vmem:[%s2498_s2 + $0x50] sm:$0xff] }
 0x25d   :  { %739 = vmatpush.msra.mxu1 %v2034_v23  ;;  %1128 = vmatpush.msra.mxu2 %v2090_v35  ;;  %v1170_v35 = vld [vmem:[%s2498_s2 + $0x48] sm:$0xff] }
 0x25f   :  { %740 = vmatpush.msra.mxu1 %v2051_v27  ;;  %1129 = vmatpush.msra.mxu2 %v2102_v37  ;;  %v1169_v37 = vld [vmem:[%s2498_s2 + $0x40] sm:$0xff] }
 0x261   :  { %741 = vmatpush.msra.mxu1 %v2081_v34  ;;  %1130 = vmatpush.msra.mxu2 %v2116_v39  ;;  %v1168_v39 = vld [vmem:[%s2498_s2 + $0x38] sm:$0xff] }
 0x263   :  { %742 = vmatpush.msra.mxu1 %v2095_v36  ;;  %1131 = vmatpush.msra.mxu2 %v2130_v41  ;;  %v1389_v41 = vld [vmem:[%s2499_s3] ss:$0 sm:$0xff] }
 0x265   :  { %743 = vmatpush.msra.mxu1 %v2107_v38 }
 0x267   :  { %744 = vmatpush.msra.mxu1 %v2121_v40 }
 0x269   :  { %745 = vmatpush.msra.mxu1 %v2135_v42 }
 0x26b   :  { %746 = vmatpush.msra.mxu1 %v2147_v44 }
 0x2c9   :  { %v424_v2 = vpop.f32.mrf.mxu1 }
 0x2ca   :  { %v425_v3 = vadd.f32 %v424_v2, %v405_v1  ;;  %v1364_v1 = vld [vmem:[%s2496_s0 + $0x50] sm:$0xff]  ;;  %v1386_v2 = vld [vmem:[%s2499_s3] ss:$0 sm:$0xff] }
 0x2cb   :  { %889 = vmatmul.f32.vlgmr.msrb.gmra.mxu0 %v1364_v1 }
 0x2cc   :  { %1401 = vtanh.f32 %v425_v3  ;;  %v809_v3 = vpop.f32.mrf.mxu2 }
 0x2d2   :  { %v1402_v4 = vpop.eup %1401 }
 0x2d3   :  { %1353 = vst [vmem:[%s2500_s4 + $0x20] sm:$0xff] %v1402_v4  ;;  %504 = vmatmul.f32.vlgmr.msra.gmra.mxu3 %v1402_v4  ;;  %v810_v4 = vadd.f32 %v1386_v2, %v809_v3 }
 0x2d4   :  { %812 = vmatpush.msra.mxu3 %v1933_v8 }
 0x2d6   :  { %813 = vmatpush.msra.mxu3 %v1940_v9 }
 0x2d8   :  { %814 = vmatpush.msra.mxu3 %v1950_v11 }
 0x2da   :  { %815 = vmatpush.msra.mxu3 %v1964_v13 }
 0x2dc   :  { %816 = vmatpush.msra.mxu3 %v1978_v15 }
 0x2de   :  { %817 = vmatpush.msra.mxu3 %v1992_v17 }
 0x2e0   :  { %818 = vmatpush.msra.mxu3 %v2006_v19 }
 0x2e2   :  { %819 = vmatpush.msra.mxu3 %v2020_v21 }
 0x2e4   :  { %820 = vmatpush.msra.mxu3 %v2034_v23 }
 0x2e6   :  { %821 = vmatpush.msra.mxu3 %v2051_v27 }
 0x2e8   :  { %822 = vmatpush.msra.mxu3 %v2081_v34 }
 0x2ea   :  { %823 = vmatpush.msra.mxu3 %v2095_v36 }
 0x2ec   :  { %824 = vmatpush.msra.mxu3 %v2107_v38 }
 0x2ee   :  { %825 = vmatpush.msra.mxu3 %v2121_v40 }
 0x2f0   :  { %826 = vmatpush.msra.mxu3 %v2135_v42 }
 0x2f2   :  { %827 = vmatpush.msra.mxu3 %v2147_v44 }
 0x348   :  { %v890_v10 = vpop.f32.mrf.mxu0 }
 0x356   :  { %v505_v30 = vpop.f32.mrf.mxu3 }
 0x357   :  { %v506_v31 = vadd.f32 %v505_v30, %v486_v29  ;;  %v1173_v29 = vld [vmem:[%s2498_s2 + $0x60] sm:$0xff] }
 0x358   :  { %v1189_v30 = vld [vmem:[%s2498_s2 + $0xe0] sm:$0xff] }
 0x359   :  { %1403 = vtanh.f32 %v506_v31  ;;  %v1172_v31 = vld [vmem:[%s2498_s2 + $0x58] sm:$0xff] }
 0x35f   :  { %v1404_v32 = vpop.eup %1403 }
 0x360   :  { %1355 = vst [vmem:[%s2500_s4 + $0x28] sm:$0xff] %v1404_v32  ;;  %585 = vmatmul.f32.vlgmr.msrb.gmra.mxu1 %v1404_v32  ;;  %v1188_v32 = vld [vmem:[%s2498_s2 + $0xd8] sm:$0xff] }
 0x361   :  { %893 = vmatpush.msrb.mxu1 %v1933_v8 }
 0x363   :  { %894 = vmatpush.msrb.mxu1 %v1940_v9 }
 0x365   :  { %895 = vmatpush.msrb.mxu1 %v1950_v11 }
 0x367   :  { %896 = vmatpush.msrb.mxu1 %v1964_v13 }
 0x369   :  { %897 = vmatpush.msrb.mxu1 %v1978_v15 }
 0x36b   :  { %898 = vmatpush.msrb.mxu1 %v1992_v17 }
 0x36d   :  { %899 = vmatpush.msrb.mxu1 %v2006_v19 }
 0x36f   :  { %900 = vmatpush.msrb.mxu1 %v2020_v21 }
 0x371   :  { %901 = vmatpush.msrb.mxu1 %v2034_v23 }
 0x373   :  { %902 = vmatpush.msrb.mxu1 %v2051_v27 }
 0x375   :  { %903 = vmatpush.msrb.mxu1 %v2081_v34 }
 0x377   :  { %904 = vmatpush.msrb.mxu1 %v2095_v36 }
 0x379   :  { %905 = vmatpush.msrb.mxu1 %v2107_v38 }
 0x37b   :  { %906 = vmatpush.msrb.mxu1 %v2121_v40 }
 0x37d   :  { %907 = vmatpush.msrb.mxu1 %v2135_v42 }
 0x37f   :  { %908 = vmatpush.msrb.mxu1 %v2147_v44 }
 0x3dd   :  { %v586_v48 = vpop.f32.mrf.mxu1 }
 0x3de   :  { %v587_v49 = vadd.f32 %v586_v48, %v567_v47 }
 0x3e0   :  { %1405 = vtanh.f32 %v587_v49 }
 0x3e6   :  { %v1406_v50 = vpop.eup %1405 }
 0x3e7   :  { %1357 = vst [vmem:[%s2500_s4 + $0x30] sm:$0xff] %v1406_v50  ;;  %666 = vmatmul.f32.vlgmr.msrb.gmra.mxu3 %v1406_v50  ;;  %v1165_v50 = vld [vmem:[%s2498_s2 + $0x20] sm:$0xff] }
 0x3e8   :  { %974 = vmatpush.msrb.mxu3 %v1933_v8 }
 0x3ea   :  { %975 = vmatpush.msrb.mxu3 %v1940_v9 }
 0x3ec   :  { %976 = vmatpush.msrb.mxu3 %v1950_v11 }
 0x3ee   :  { %977 = vmatpush.msrb.mxu3 %v1964_v13 }
 0x3f0   :  { %978 = vmatpush.msrb.mxu3 %v1978_v15 }
 0x3f2   :  { %979 = vmatpush.msrb.mxu3 %v1992_v17 }
 0x3f4   :  { %980 = vmatpush.msrb.mxu3 %v2006_v19 }
 0x3f6   :  { %981 = vmatpush.msrb.mxu3 %v2020_v21 }
 0x3f8   :  { %982 = vmatpush.msrb.mxu3 %v2034_v23 }
 0x3fa   :  { %983 = vmatpush.msrb.mxu3 %v2051_v27 }
 0x3fc   :  { %984 = vmatpush.msrb.mxu3 %v2081_v34 }
 0x3fe   :  { %985 = vmatpush.msrb.mxu3 %v2095_v36 }
 0x400   :  { %986 = vmatpush.msrb.mxu3 %v2107_v38 }
 0x402   :  { %987 = vmatpush.msrb.mxu3 %v2121_v40 }
 0x404   :  { %988 = vmatpush.msrb.mxu3 %v2135_v42 }
 0x406   :  { %989 = vmatpush.msrb.mxu3 %v2147_v44 }
 0x46a   :  { %v667_v55 = vpop.f32.mrf.mxu3 }
 0x46b   :  { %v668_v56 = vadd.f32 %v667_v55, %v648_v54  ;;  %v1163_v54 = vld [vmem:[%s2498_s2 + $0x10] sm:$0xff]  ;;  %v1180_v55 = vld [vmem:[%s2498_s2 + $0x98] sm:$0xff] }
 0x46d   :  { %1407 = vtanh.f32 %v668_v56  ;;  %v1162_v56 = vld [vmem:[%s2498_s2 + $0x8] sm:$0xff] }
 0x473   :  { %v1408_v57 = vpop.eup %1407 }
 0x474   :  { %1359 = vst [vmem:[%s2500_s4 + $0x38] sm:$0xff] %v1408_v57  ;;  %747 = vmatmul.f32.vlgmr.msra.gmra.mxu1 %v1408_v57  ;;  %v1179_v57 = vld [vmem:[%s2498_s2 + $0x90] sm:$0xff] }
 0x475   :  { %1055 = vmatpush.msra.mxu1 %v1933_v8 }
 0x477   :  { %1056 = vmatpush.msra.mxu1 %v1940_v9 }
 0x479   :  { %1057 = vmatpush.msra.mxu1 %v1950_v11 }
 0x47b   :  { %1058 = vmatpush.msra.mxu1 %v1964_v13 }
 0x47d   :  { %1059 = vmatpush.msra.mxu1 %v1978_v15 }
 0x47f   :  { %1060 = vmatpush.msra.mxu1 %v1992_v17 }
 0x481   :  { %1061 = vmatpush.msra.mxu1 %v2006_v19 }
 0x483   :  { %1062 = vmatpush.msra.mxu1 %v2020_v21 }
 0x485   :  { %1063 = vmatpush.msra.mxu1 %v2034_v23 }
 0x487   :  { %1064 = vmatpush.msra.mxu1 %v2051_v27 }
 0x489   :  { %1065 = vmatpush.msra.mxu1 %v2081_v34 }
 0x48b   :  { %1066 = vmatpush.msra.mxu1 %v2095_v36 }
 0x48d   :  { %1067 = vmatpush.msra.mxu1 %v2107_v38 }
 0x48f   :  { %1068 = vmatpush.msra.mxu1 %v2121_v40 }
 0x491   :  { %1069 = vmatpush.msra.mxu1 %v2135_v42 }
 0x493   :  { %1070 = vmatpush.msra.mxu1 %v2147_v44 }
 0x4f1   :  { %v748_v62 = vpop.f32.mrf.mxu1 }
 0x4f2   :  { %v749_v63 = vadd.f32 %v748_v62, %v729_v61  ;;  %v1177_v61 = vld [vmem:[%s2498_s2 + $0x80] sm:$0xff] }
 0x4f3   :  { %v1390_v62 = vld [vmem:[%s2499_s3] ss:$0 sm:$0xff] }
 0x4f4   :  { %1409 = vtanh.f32 %v749_v63 }
 0x4fa   :  { %v1410_v0 = vpop.eup %1409 }
 0x4fb   :  { %1361 = vst [vmem:[%s2500_s4 + $0x40] sm:$0xff] %v1410_v0  ;;  %828 = vmatmul.f32.vlgmr.msra.gmra.mxu3 %v1410_v0 }
 0x4fc   :  { %1136 = vmatpush.msra.mxu3 %v1933_v8  ;;  %v1366_v8 = vld [vmem:[%s2496_s0 + $0x58] sm:$0xff] }
 0x4fd   :  { %970 = vmatmul.f32.vlgmr.msrb.gmra.mxu2 %v1366_v8 }
 0x4fe   :  { %1137 = vmatpush.msra.mxu3 %v1940_v9  ;;  %v1387_v9 = vld [vmem:[%s2499_s3] ss:$0 sm:$0xff] }
 0x500   :  { %1138 = vmatpush.msra.mxu3 %v1950_v11  ;;  %v891_v11 = vadd.f32 %v1387_v9, %v890_v10 }
 0x502   :  { %1139 = vmatpush.msra.mxu3 %v1964_v13 }
 0x504   :  { %1140 = vmatpush.msra.mxu3 %v1978_v15  ;;  %v1368_v15 = vld [vmem:[%s2496_s0 + $0x60] sm:$0xff] }
 0x505   :  { %1051 = vmatmul.f32.vlgmr.msra.gmra.mxu0 %v1368_v15  ;;  %1132 = vmatmul.f32.vlgmr.msra.gmra.mxu2 %v1370_v22 }
 0x506   :  { %1141 = vmatpush.msra.mxu3 %v1992_v17 }
 0x508   :  { %1142 = vmatpush.msra.mxu3 %v2006_v19 }
 0x50a   :  { %1143 = vmatpush.msra.mxu3 %v2020_v21 }
 0x50c   :  { %1144 = vmatpush.msra.mxu3 %v2034_v23  ;;  %v1176_v23 = vld [vmem:[%s2498_s2 + $0x78] sm:$0xff] }
 0x50d   :  { %1197 = vmatpush.msrb.mxu0 %v1176_v23  ;;  %1278 = vmatpush.msrb.mxu2 %v1176_v23 }
 0x50e   :  { %1145 = vmatpush.msra.mxu3 %v2051_v27  ;;  %v1174_v27 = vld [vmem:[%s2498_s2 + $0x68] sm:$0xff] }
 0x50f   :  { %1198 = vmatpush.msrb.mxu0 %v1175_v24  ;;  %1279 = vmatpush.msrb.mxu2 %v1175_v24 }
 0x510   :  { %1146 = vmatpush.msra.mxu3 %v2081_v34  ;;  %v1187_v34 = vld [vmem:[%s2498_s2 + $0xd0] sm:$0xff] }
 0x511   :  { %1199 = vmatpush.msrb.mxu0 %v1174_v27  ;;  %1280 = vmatpush.msrb.mxu2 %v1174_v27 }
 0x512   :  { %1147 = vmatpush.msra.mxu3 %v2095_v36  ;;  %v1186_v36 = vld [vmem:[%s2498_s2 + $0xc8] sm:$0xff] }
 0x513   :  { %1200 = vmatpush.msrb.mxu0 %v1173_v29  ;;  %1281 = vmatpush.msrb.mxu2 %v1173_v29 }
 0x514   :  { %1148 = vmatpush.msra.mxu3 %v2107_v38  ;;  %v1185_v38 = vld [vmem:[%s2498_s2 + $0xc0] sm:$0xff] }
 0x515   :  { %1201 = vmatpush.msrb.mxu0 %v1172_v31  ;;  %1282 = vmatpush.msrb.mxu2 %v1172_v31 }
 0x516   :  { %1149 = vmatpush.msra.mxu3 %v2121_v40  ;;  %v1184_v40 = vld [vmem:[%s2498_s2 + $0xb8] sm:$0xff] }
 0x517   :  { %1202 = vmatpush.msrb.mxu0 %v1171_v33  ;;  %1283 = vmatpush.msrb.mxu2 %v1171_v33 }
 0x518   :  { %1150 = vmatpush.msra.mxu3 %v2135_v42 }
 0x519   :  { %1203 = vmatpush.msrb.mxu0 %v1170_v35  ;;  %1284 = vmatpush.msrb.mxu2 %v1170_v35 }
 0x51a   :  { %1151 = vmatpush.msra.mxu3 %v2147_v44  ;;  %v1183_v44 = vld [vmem:[%s2498_s2 + $0xb0] sm:$0xff] }
 0x51b   :  { %1204 = vmatpush.msrb.mxu0 %v1169_v37  ;;  %1285 = vmatpush.msrb.mxu2 %v1169_v37 }
 0x51d   :  { %1205 = vmatpush.msrb.mxu0 %v1168_v39  ;;  %1286 = vmatpush.msrb.mxu2 %v1168_v39 }
 0x51f   :  { %1206 = vmatpush.msrb.mxu0 %v1167_v43  ;;  %1287 = vmatpush.msrb.mxu2 %v1167_v43 }
 0x521   :  { %1207 = vmatpush.msrb.mxu0 %v1166_v45  ;;  %1288 = vmatpush.msrb.mxu2 %v1166_v45 }
 0x523   :  { %1208 = vmatpush.msrb.mxu0 %v1165_v50  ;;  %1289 = vmatpush.msrb.mxu2 %v1165_v50 }
 0x525   :  { %1209 = vmatpush.msrb.mxu0 %v1164_v52  ;;  %1290 = vmatpush.msrb.mxu2 %v1164_v52 }
 0x527   :  { %1210 = vmatpush.msrb.mxu0 %v1163_v54  ;;  %1291 = vmatpush.msrb.mxu2 %v1163_v54 }
 0x529   :  { %1211 = vmatpush.msrb.mxu0 %v1162_v56  ;;  %1292 = vmatpush.msrb.mxu2 %v1162_v56 }
 0x52b   :  { %1212 = vmatpush.msrb.mxu0 %v1161_v58  ;;  %1293 = vmatpush.msrb.mxu2 %v1161_v58 }
 0x52c   :  { %1213 = vmatmul.f32.vlgmr.msrb.gmra.mxu0 %v1372_v60 }
 0x57e   :  { %v829_v5 = vpop.f32.mrf.mxu3 }
 0x57f   :  { %v830_v6 = vadd.f32 %v829_v5, %v810_v4  ;;  %v1374_v4 = vld [vmem:[%s2496_s0 + $0x78] sm:$0xff]  ;;  %v1391_v5 = vld [vmem:[%s2499_s3] ss:$0 sm:$0xff]  ;;  %s1451_s0 = smov [#allocation3]  }
 0x580   :  { %v971_v17 = vpop.f32.mrf.mxu2  ;;  %1294 = vmatmul.f32.vlgmr.msrb.gmra.mxu2 %v1374_v4  ;;  %s1333_s21 = sshll.u32 %s1451_s0, 4  ;;  %s1334_s21 = int_to_ptr.vmem [resolvable:$true] %s1333_s21 }
 0x581   :  { %1411 = vtanh.f32 %v830_v6  ;;  %v972_v18 = vadd.f32 %v1388_v16, %v971_v17 }
 0x582   :  { %v1052_v42 = vpop.f32.mrf.mxu0 }
 0x583   :  { %v1053_v46 = vadd.f32 %v1389_v41, %v1052_v42 }
 0x587   :  { %v1412_v7 = vpop.eup %1411 }
 0x588   :  { %1363 = vst [vmem:[%s2500_s4 + $0x48] sm:$0xff] %v1412_v7  ;;  %909 = vmatmul.f32.vlgmr.msrb.gmra.mxu1 %v1412_v7  ;;  %v1133_v63 = vpop.f32.mrf.mxu2 }
 0x589   :  { %1217 = vmatpush.msrb.mxu1 %v1192_v25  ;;  %v1134_v0 = vadd.f32 %v1390_v62, %v1133_v63 }
 0x58b   :  { %1218 = vmatpush.msrb.mxu1 %v1191_v26 }
 0x58d   :  { %1219 = vmatpush.msrb.mxu1 %v1190_v28 }
 0x58f   :  { %1220 = vmatpush.msrb.mxu1 %v1189_v30 }
 0x591   :  { %1221 = vmatpush.msrb.mxu1 %v1188_v32 }
 0x593   :  { %1222 = vmatpush.msrb.mxu1 %v1187_v34 }
 0x595   :  { %1223 = vmatpush.msrb.mxu1 %v1186_v36 }
 0x597   :  { %1224 = vmatpush.msrb.mxu1 %v1185_v38 }
 0x599   :  { %1225 = vmatpush.msrb.mxu1 %v1184_v40 }
 0x59b   :  { %1226 = vmatpush.msrb.mxu1 %v1183_v44 }
 0x59d   :  { %1227 = vmatpush.msrb.mxu1 %v1182_v51 }
 0x59f   :  { %1228 = vmatpush.msrb.mxu1 %v1181_v53 }
 0x5a1   :  { %1229 = vmatpush.msrb.mxu1 %v1180_v55 }
 0x5a3   :  { %1230 = vmatpush.msrb.mxu1 %v1179_v57 }
 0x5a5   :  { %1231 = vmatpush.msrb.mxu1 %v1178_v59 }
 0x5a7   :  { %1232 = vmatpush.msrb.mxu1 %v1177_v61 }
 0x5a9   :  { %v1214_v6 = vpop.f32.mrf.mxu0 }
 0x5aa   :  { %v1215_v7 = vadd.f32 %v1391_v5, %v1214_v6 }
 0x605   :  { %v910_v12 = vpop.f32.mrf.mxu1 }
 0x606   :  { %v911_v13 = vadd.f32 %v910_v12, %v891_v11  ;;  %v1392_v11 = vld [vmem:[%s2499_s3] ss:$0 sm:$0xff]  ;;  %v1295_v12 = vpop.f32.mrf.mxu2 }
 0x608   :  { %1413 = vtanh.f32 %v911_v13  ;;  %v1296_v13 = vadd.f32 %v1392_v11, %v1295_v12 }
 0x60e   :  { %v1414_v14 = vpop.eup %1413 }
 0x60f   :  { %1365 = vst [vmem:[%s2500_s4 + $0x50] sm:$0xff] %v1414_v14  ;;  %990 = vmatmul.f32.vlgmr.msrb.gmra.mxu3 %v1414_v14 }
 0x610   :  { %1298 = vmatpush.msrb.mxu3 %v1192_v25 }
 0x612   :  { %1299 = vmatpush.msrb.mxu3 %v1191_v26 }
 0x614   :  { %1300 = vmatpush.msrb.mxu3 %v1190_v28 }
 0x616   :  { %1301 = vmatpush.msrb.mxu3 %v1189_v30 }
 0x618   :  { %1302 = vmatpush.msrb.mxu3 %v1188_v32 }
 0x61a   :  { %1303 = vmatpush.msrb.mxu3 %v1187_v34 }
 0x61c   :  { %1304 = vmatpush.msrb.mxu3 %v1186_v36 }
 0x61e   :  { %1305 = vmatpush.msrb.mxu3 %v1185_v38 }
 0x620   :  { %1306 = vmatpush.msrb.mxu3 %v1184_v40 }
 0x622   :  { %1307 = vmatpush.msrb.mxu3 %v1183_v44 }
 0x624   :  { %1308 = vmatpush.msrb.mxu3 %v1182_v51 }
 0x626   :  { %1309 = vmatpush.msrb.mxu3 %v1181_v53 }
 0x628   :  { %1310 = vmatpush.msrb.mxu3 %v1180_v55 }
 0x62a   :  { %1311 = vmatpush.msrb.mxu3 %v1179_v57 }
 0x62c   :  { %1312 = vmatpush.msrb.mxu3 %v1178_v59 }
 0x62e   :  { %1313 = vmatpush.msrb.mxu3 %v1177_v61 }
 0x692   :  { %v991_v19 = vpop.f32.mrf.mxu3 }
 0x693   :  { %v992_v20 = vadd.f32 %v991_v19, %v972_v18 }
 0x695   :  { %1415 = vtanh.f32 %v992_v20 }
 0x69b   :  { %v1416_v21 = vpop.eup %1415 }
 0x69c   :  { %1367 = vst [vmem:[%s2500_s4 + $0x58] sm:$0xff] %v1416_v21  ;;  %1071 = vmatmul.f32.vlgmr.msra.gmra.mxu1 %v1416_v21 }
 0x719   :  { %v1072_v47 = vpop.f32.mrf.mxu1 }
 0x71a   :  { %v1073_v48 = vadd.f32 %v1072_v47, %v1053_v46 }
 0x71c   :  { %1417 = vtanh.f32 %v1073_v48 }
 0x722   :  { %v1418_v49 = vpop.eup %1417 }
 0x723   :  { %1369 = vst [vmem:[%s2500_s4 + $0x60] sm:$0xff] %v1418_v49  ;;  %1152 = vmatmul.f32.vlgmr.msra.gmra.mxu3 %v1418_v49 }
 0x7a6   :  { %v1153_v1 = vpop.f32.mrf.mxu3 }
 0x7a7   :  { %v1154_v2 = vadd.f32 %v1153_v1, %v1134_v0 }
 0x7a9   :  { %1419 = vtanh.f32 %v1154_v2 }
 0x7af   :  { %v1420_v3 = vpop.eup %1419 }
 0x7b0   :  { %1371 = vst [vmem:[%s2500_s4 + $0x68] sm:$0xff] %v1420_v3  ;;  %1233 = vmatmul.f32.vlgmr.msrb.gmra.mxu1 %v1420_v3 }
 0x82d   :  { %v1234_v8 = vpop.f32.mrf.mxu1 }
 0x82e   :  { %v1235_v9 = vadd.f32 %v1234_v8, %v1215_v7 }
 0x830   :  { %1421 = vtanh.f32 %v1235_v9 }
 0x836   :  { %v1422_v10 = vpop.eup %1421 }
 0x837   :  { %1373 = vst [vmem:[%s2500_s4 + $0x70] sm:$0xff] %v1422_v10  ;;  %1314 = vmatmul.f32.vlgmr.msrb.gmra.mxu3 %v1422_v10 }
 0x8ba   :  { %v1315_v14 = vpop.f32.mrf.mxu3 }
 0x8bb   :  { %v1316_v15 = vadd.f32 %v1315_v14, %v1296_v13 }
 0x8bd   :  { %1423 = vtanh.f32 %v1316_v15 }
 0x8c3   :  { %v1424_v16 = vpop.eup %1423 }
 0x8c4   :  { %1375 = vst [vmem:[%s2500_s4 + $0x78] sm:$0xff] %v1424_v16 }
 0x8c5   :  { %1325 = vst [vmem:[#allocation3] sm:$0xff] %v1424_v16 }
 0x8c6   :  { %1338 = dma.vmem_to_hbm [thread:$0]  %s1334_s21, 128, %s1336_s24, [#allocation4]  }
 0x8c7   :  { %1449 = dma.done.wait [#allocation4], 128  }
 0x8c8   :  { %1450 = vsyncadd [#allocation4], 4294967168 }
 0x8c9   :  { %1345 = vsyncpa [#allocation4], 1 }

</bundles_post_ra>
